<compile_context>
chip_gen: v6e
topology: v6e:2x2x1
jax: 0.10.0
libtpu: 0.0.40
codegen_flags: <defaults>
</compile_context>

<pallas_src>
import functools

import jax
import jax.numpy as jnp
from jax.experimental import pallas as pl
from jax.experimental.pallas import tpu as pltpu

# Logical (PyTorch) dims
D_IN = 784
D_H = 400
D_Z = 10

# Lane-dense padded dims (multiples of 128)
D_IN_P = 896           # 7 * 128
D_H_P = 512            # 4 * 128
D_Z_P = 128            # 1 * 128
D_HEADS = 2 * D_Z_P    # fused [mu || logvar] output width

# Fused bias slab offsets (all multiples of 128 -> layout-clean static slices)
OFF_B1 = 0
OFF_BH = D_H_P                      # 512
OFF_B3 = D_H_P + D_HEADS            # 768
OFF_B4 = 2 * D_H_P + D_HEADS        # 1280
D_BIAS = 2 * D_H_P + D_HEADS + D_IN_P   # 2176 = 17 * 128


def _round_up(n, m):
    return (n + m - 1) // m * m


def _vae_kernel(x_ref, eps_ref,
                w1_ref, wh_ref, w3_ref, w4_ref, bias_ref,
                recon_ref, muvar_ref, *, bf16_epilogue):
    # Static, 128-aligned slices of the fused bias slab.
    b1 = bias_ref[:, OFF_B1:OFF_B1 + D_H_P]
    bh = bias_ref[:, OFF_BH:OFF_BH + D_HEADS]
    b3 = bias_ref[:, OFF_B3:OFF_B3 + D_H_P]
    b4 = bias_ref[:, OFF_B4:OFF_B4 + D_IN_P]

    # encode: h1 = relu(x @ W1 + b1)   (bf16 operands, f32 accumulate)
    h1 = jnp.dot(x_ref[...], w1_ref[...],
                 preferred_element_type=jnp.float32) + b1
    h1 = jnp.maximum(h1, 0.0).astype(jnp.bfloat16)   # bf16 right after ReLU

    # fused heads: [mu || logvar] = h1 @ [W21 || W22] + [b21 || b22]
    heads = jnp.dot(h1, wh_ref[...],
                    preferred_element_type=jnp.float32) + bh
    mu = heads[:, :D_Z_P]
    logvar = heads[:, D_Z_P:]

    # reparameterize (training mode): z = mu + eps * exp(0.5 * logvar)
    z = (mu + eps_ref[...] * jnp.exp(0.5 * logvar)).astype(jnp.bfloat16)

    # decode: sigmoid(relu(z @ W3 + b3) @ W4 + b4)
    h3 = jnp.dot(z, w3_ref[...], preferred_element_type=jnp.float32) + b3
    h3 = jnp.maximum(h3, 0.0).astype(jnp.bfloat16)
    logits = jnp.dot(h3, w4_ref[...], preferred_element_type=jnp.float32) + b4

    if bf16_epilogue:
        # v6e/v7x: bf16 VPU+EUP -> run the sigmoid exp at bf16 element rate.
        recon_ref[...] = jax.nn.sigmoid(logits.astype(jnp.bfloat16))
    else:
        # v5e (no bf16 VPU/EUP): sigmoid in f32, cast only for the store.
        recon_ref[...] = jax.nn.sigmoid(logits).astype(jnp.bfloat16)

    muvar_ref[...] = heads.astype(jnp.bfloat16)


def init_params(key):
    """Parameter init mimicking PyTorch Linear defaults (uniform +/- 1/sqrt(fan_in)).
    Weights stored as (in, out); weight values are snapped to bf16 so the f32
    reference and the bf16-stored kernel weights represent identical numbers."""
    def linear(key, fan_in, fan_out):
        kw, kb = jax.random.split(key)
        bound = 1.0 / jnp.sqrt(fan_in)
        w = jax.random.uniform(kw, (fan_in, fan_out), jnp.float32, -bound, bound)
        w = w.astype(jnp.bfloat16).astype(jnp.float32)   # bf16-storage snap
        b = jax.random.uniform(kb, (1, fan_out), jnp.float32, -bound, bound)
        return w, b

    k1, k21, k22, k3, k4 = jax.random.split(key, 5)
    w1, b1 = linear(k1, D_IN, D_H)
    w21, b21 = linear(k21, D_H, D_Z)
    w22, b22 = linear(k22, D_H, D_Z)
    w3, b3 = linear(k3, D_Z, D_H)
    w4, b4 = linear(k4, D_H, D_IN)
    return (w1, b1, w21, b21, w22, b22, w3, b3, w4, b4)


def pack_params(params):
    """One-time packing (hoisted out of the per-call path): pad to lane-dense
    shapes, fuse the mu/logvar heads, concatenate biases, store weights bf16."""
    w1, b1, w21, b21, w22, b22, w3, b3, w4, b4 = params

    w1p = jnp.zeros((D_IN_P, D_H_P), jnp.bfloat16).at[:D_IN, :D_H].set(
        w1.astype(jnp.bfloat16))

    whp = jnp.zeros((D_H_P, D_HEADS), jnp.bfloat16)
    whp = whp.at[:D_H, :D_Z].set(w21.astype(jnp.bfloat16))
    whp = whp.at[:D_H, D_Z_P:D_Z_P + D_Z].set(w22.astype(jnp.bfloat16))

    # W3 padded rows MUST be zero so padded z lanes cannot leak into the decoder.
    w3p = jnp.zeros((D_Z_P, D_H_P), jnp.bfloat16).at[:D_Z, :D_H].set(
        w3.astype(jnp.bfloat16))

    w4p = jnp.zeros((D_H_P, D_IN_P), jnp.bfloat16).at[:D_H, :D_IN].set(
        w4.astype(jnp.bfloat16))

    # Fused bias slab (f32), all segments start at 128-lane boundaries.
    biasp = jnp.zeros((1, D_BIAS), jnp.float32)
    biasp = biasp.at[:, OFF_B1:OFF_B1 + D_H].set(b1)
    biasp = biasp.at[:, OFF_BH:OFF_BH + D_Z].set(b21)
    biasp = biasp.at[:, OFF_BH + D_Z_P:OFF_BH + D_Z_P + D_Z].set(b22)
    biasp = biasp.at[:, OFF_B3:OFF_B3 + D_H].set(b3)
    biasp = biasp.at[:, OFF_B4:OFF_B4 + D_IN].set(b4)

    return (w1p, whp, w3p, w4p, biasp)


def _choose_tiling(B, batch_tile):
    """Pick (tile, padded_batch). Guarantees >= 2 grid steps whenever the
    (8-row padded) batch allows it so the PARALLEL axis can split across
    v7x's two TensorCores."""
    b_pad8 = _round_up(B, 8)
    if b_pad8 >= 16:
        tb = min(batch_tile, _round_up((b_pad8 + 1) // 2, 8))
    else:
        tb = b_pad8
    b_pad = _round_up(b_pad8, tb)
    return tb, b_pad


@functools.partial(jax.jit, static_argnames=("batch_tile",))
def vae_forward(x, eps, packed_params, *, batch_tile=1024):
    """x: (B, 1, 28, 28) or (B, 784) float32; eps: (B, 10) float32.
    packed_params: output of pack_params (computed once, outside this call)."""
    B = x.shape[0]
    x_flat = x.reshape(B, D_IN).astype(jnp.float32)

    tb, b_pad = _choose_tiling(B, batch_tile)

    w1p, whp, w3p, w4p, biasp = packed_params

    # Zero-pad batch rows + feature lanes (padded lanes are provably inert).
    x_p = jnp.zeros((b_pad, D_IN_P), jnp.bfloat16).at[:B, :D_IN].set(
        x_flat.astype(jnp.bfloat16))
    eps_p = jnp.zeros((b_pad, D_Z_P), jnp.float32).at[:B, :D_Z].set(
        eps.astype(jnp.float32))

    grid = (b_pad // tb,)
    batch_map = lambda i: (i, 0)   # batch-tiled operands
    const_map = lambda i: (0, 0)   # weights resident in VMEM across the grid

    in_specs = [
        pl.BlockSpec((tb, D_IN_P), batch_map),      # x tile
        pl.BlockSpec((tb, D_Z_P), batch_map),       # eps tile
        pl.BlockSpec((D_IN_P, D_H_P), const_map),   # W1
        pl.BlockSpec((D_H_P, D_HEADS), const_map),  # W21||W22
        pl.BlockSpec((D_Z_P, D_H_P), const_map),    # W3
        pl.BlockSpec((D_H_P, D_IN_P), const_map),   # W4
        pl.BlockSpec((1, D_BIAS), const_map),       # fused bias slab
    ]
    out_specs = (
        pl.BlockSpec((tb, D_IN_P), batch_map),      # recon (bf16, lane-dense)
        pl.BlockSpec((tb, D_HEADS), batch_map),     # fused mu||logvar (bf16)
    )

    # bf16 epilogue (sigmoid) only where the VPU/EUP support bf16 natively.
    kind = jax.devices()[0].device_kind.lower()
    bf16_epilogue = ("v6" in kind) or ("v7" in kind)

    weight_bytes = sum(int(p.size) * p.dtype.itemsize
                       for p in (w1p, whp, w3p, w4p, biasp))
    io_bytes = (b_pad * D_IN_P * 2 + b_pad * D_Z_P * 4          # inputs
                + b_pad * D_IN_P * 2 + b_pad * D_HEADS * 2)     # bf16 outputs
    flops = 2 * b_pad * (D_IN_P * D_H_P + D_H_P * D_HEADS
                         + D_Z_P * D_H_P + D_H_P * D_IN_P)
    cost = pl.CostEstimate(flops=flops,
                           transcendentals=b_pad * (D_Z_P + D_IN_P),
                           bytes_accessed=weight_bytes + io_bytes)

    recon_p, muvar = pl.pallas_call(
        functools.partial(_vae_kernel, bf16_epilogue=bf16_epilogue),
        grid=grid,
        in_specs=in_specs,
        out_specs=out_specs,
        out_shape=(
            jax.ShapeDtypeStruct((b_pad, D_IN_P), jnp.bfloat16),
            jax.ShapeDtypeStruct((b_pad, D_HEADS), jnp.bfloat16),
        ),
        compiler_params=pltpu.CompilerParams(
            dimension_semantics=(pltpu.PARALLEL,),
            vmem_limit_bytes=32 * 1024 * 1024,
        ),
        cost_estimate=cost,
    )(x_p, eps_p, w1p, whp, w3p, w4p, biasp)

    recon = recon_p[:B, :D_IN].astype(jnp.float32)
    mu = muvar[:B, :D_Z].astype(jnp.float32)
    logvar = muvar[:B, D_Z_P:D_Z_P + D_Z].astype(jnp.float32)
    return recon, mu, logvar


def vae_forward_ref(x, eps, params):
    """Pure-JAX f32 reference of the PyTorch forward (training mode)."""
    w1, b1, w21, b21, w22, b22, w3, b3, w4, b4 = params
    B = x.shape[0]
    xf = x.reshape(B, D_IN)
    h1 = jax.nn.relu(xf @ w1 + b1)
    mu = h1 @ w21 + b21
    logvar = h1 @ w22 + b22
    z = mu + eps * jnp.exp(0.5 * logvar)
    h3 = jax.nn.relu(z @ w3 + b3)
    recon = jax.nn.sigmoid(h3 @ w4 + b4)
    return recon, mu, logvar


if __name__ == "__main__":
    key = jax.random.PRNGKey(0)
    kp, kx, ke = jax.random.split(key, 3)

    params = init_params(kp)
    packed = pack_params(params)   # one-time packing, hoisted out of the call

    B = 2
    x = jax.random.uniform(kx, (B, 1, 28, 28), jnp.float32)   # MNIST-like input
    eps = jax.random.normal(ke, (B, D_Z), jnp.float32)        # reparameterization noise

    recon, mu, logvar = jax.block_until_ready(vae_forward(x, eps, packed))

    # correctness check against pure-JAX f32 reference (kernel uses bf16 matmul
    # operands / bf16 outputs with f32 accumulation -> relaxed tolerance)
    r_ref, mu_ref, lv_ref = vae_forward_ref(x, eps, params)
    assert recon.shape == (B, D_IN) and mu.shape == (B, D_Z) and logvar.shape == (B, D_Z)
    assert jnp.allclose(recon, r_ref, atol=3e-2), float(jnp.abs(recon - r_ref).max())
    assert jnp.allclose(mu, mu_ref, atol=3e-2), float(jnp.abs(mu - mu_ref).max())
    assert jnp.allclose(logvar, lv_ref, atol=3e-2), float(jnp.abs(logvar - lv_ref).max())

    print("KERNEL_OK")
</pallas_src>

<mosaic_0001>
module attributes {stable_mosaic.version = 11 : i64} {
  func.func @_vae_kernel(%arg0: i32, %arg1: memref<8x896xbf16, #tpu.memory_space<vmem>>, %arg2: memref<8x128xf32, #tpu.memory_space<vmem>>, %arg3: memref<896x512xbf16, #tpu.memory_space<vmem>>, %arg4: memref<512x256xbf16, #tpu.memory_space<vmem>>, %arg5: memref<128x512xbf16, #tpu.memory_space<vmem>>, %arg6: memref<512x896xbf16, #tpu.memory_space<vmem>>, %arg7: memref<1x2176xf32, #tpu.memory_space<vmem>>, %arg8: memref<8x896xbf16, #tpu.memory_space<vmem>>, %arg9: memref<8x256xbf16, #tpu.memory_space<vmem>>) attributes {dimension_semantics = [#tpu.dimension_semantics<parallel>], iteration_bounds = array<i64: 1>, scalar_prefetch = 0 : i64, scratch_operands = 0 : i64, tpu.core_type = #tpu.core_type<tc>, window_params = [{transform_indices = @transform_0, window_bounds = array<i64: 8, 896>}, {transform_indices = @transform_1, window_bounds = array<i64: 8, 128>}, {pipeline_mode = #tpu.pipeline_mode<synchronous>, transform_indices = @transform_2, window_bounds = array<i64: 896, 512>}, {pipeline_mode = #tpu.pipeline_mode<synchronous>, transform_indices = @transform_3, window_bounds = array<i64: 512, 256>}, {pipeline_mode = #tpu.pipeline_mode<synchronous>, transform_indices = @transform_4, window_bounds = array<i64: 128, 512>}, {pipeline_mode = #tpu.pipeline_mode<synchronous>, transform_indices = @transform_5, window_bounds = array<i64: 512, 896>}, {pipeline_mode = #tpu.pipeline_mode<synchronous>, transform_indices = @transform_6, window_bounds = array<i64: 1, 2176>}, {transform_indices = @transform_7, window_bounds = array<i64: 8, 896>}, {transform_indices = @transform_8, window_bounds = array<i64: 8, 256>}]} {
    %c0 = arith.constant 0 : index
    %c0_0 = arith.constant 0 : index
    %0 = vector.load %arg7[%c0, %c0_0] : memref<1x2176xf32, #tpu.memory_space<vmem>>, vector<1x512xf32>
    %c0_1 = arith.constant 0 : index
    %c512 = arith.constant 512 : index
    %1 = vector.load %arg7[%c0_1, %c512] : memref<1x2176xf32, #tpu.memory_space<vmem>>, vector<1x256xf32>
    %c0_2 = arith.constant 0 : index
    %c768 = arith.constant 768 : index
    %2 = vector.load %arg7[%c0_2, %c768] : memref<1x2176xf32, #tpu.memory_space<vmem>>, vector<1x512xf32>
    %c0_3 = arith.constant 0 : index
    %c1280 = arith.constant 1280 : index
    %3 = vector.load %arg7[%c0_3, %c1280] : memref<1x2176xf32, #tpu.memory_space<vmem>>, vector<1x896xf32>
    %c0_4 = arith.constant 0 : index
    %c0_5 = arith.constant 0 : index
    %4 = vector.load %arg1[%c0_4, %c0_5] : memref<8x896xbf16, #tpu.memory_space<vmem>>, vector<8x896xbf16>
    %c0_6 = arith.constant 0 : index
    %c0_7 = arith.constant 0 : index
    %5 = vector.load %arg3[%c0_6, %c0_7] : memref<896x512xbf16, #tpu.memory_space<vmem>>, vector<896x512xbf16>
    %cst = arith.constant dense<0.000000e+00> : vector<8x512xf32>
    %6 = tpu.matmul %4, %5, %cst {dimension_numbers = #tpu.dot_dimension_numbers<[1], [0], [0], [1], [0, 0, 1, 1], [], []>} : vector<8x896xbf16>, vector<896x512xbf16>, vector<8x512xf32> -> vector<8x512xf32>
    %7 = vector.broadcast %0 : vector<1x512xf32> to vector<8x512xf32>
    %8 = arith.addf %6, %7 : vector<8x512xf32>
    %cst_8 = arith.constant 0.000000e+00 : f32
    %9 = vector.broadcast %cst_8 : f32 to vector<8x512xf32>
    %10 = arith.maximumf %8, %9 : vector<8x512xf32>
    %11 = arith.truncf %10 : vector<8x512xf32> to vector<8x512xbf16>
    %c0_9 = arith.constant 0 : index
    %c0_10 = arith.constant 0 : index
    %12 = vector.load %arg4[%c0_9, %c0_10] : memref<512x256xbf16, #tpu.memory_space<vmem>>, vector<512x256xbf16>
    %cst_11 = arith.constant dense<0.000000e+00> : vector<8x256xf32>
    %13 = tpu.matmul %11, %12, %cst_11 {dimension_numbers = #tpu.dot_dimension_numbers<[1], [0], [0], [1], [0, 0, 1, 1], [], []>} : vector<8x512xbf16>, vector<512x256xbf16>, vector<8x256xf32> -> vector<8x256xf32>
    %14 = vector.broadcast %1 : vector<1x256xf32> to vector<8x256xf32>
    %15 = arith.addf %13, %14 : vector<8x256xf32>
    %16 = vector.extract_strided_slice %15 {offsets = [0, 0], sizes = [8, 128], strides = [1, 1]} : vector<8x256xf32> to vector<8x128xf32>
    %17 = vector.extract_strided_slice %15 {offsets = [0, 128], sizes = [8, 128], strides = [1, 1]} : vector<8x256xf32> to vector<8x128xf32>
    %c0_12 = arith.constant 0 : index
    %c0_13 = arith.constant 0 : index
    %18 = vector.load %arg2[%c0_12, %c0_13] : memref<8x128xf32, #tpu.memory_space<vmem>>, vector<8x128xf32>
    %cst_14 = arith.constant 5.000000e-01 : f32
    %19 = vector.broadcast %cst_14 : f32 to vector<8x128xf32>
    %20 = arith.mulf %19, %17 : vector<8x128xf32>
    %21 = math.exp %20 : vector<8x128xf32>
    %22 = arith.mulf %18, %21 : vector<8x128xf32>
    %23 = arith.addf %16, %22 : vector<8x128xf32>
    %24 = arith.truncf %23 : vector<8x128xf32> to vector<8x128xbf16>
    %c0_15 = arith.constant 0 : index
    %c0_16 = arith.constant 0 : index
    %25 = vector.load %arg5[%c0_15, %c0_16] : memref<128x512xbf16, #tpu.memory_space<vmem>>, vector<128x512xbf16>
    %cst_17 = arith.constant dense<0.000000e+00> : vector<8x512xf32>
    %26 = tpu.matmul %24, %25, %cst_17 {dimension_numbers = #tpu.dot_dimension_numbers<[1], [0], [0], [1], [0, 0, 1, 1], [], []>} : vector<8x128xbf16>, vector<128x512xbf16>, vector<8x512xf32> -> vector<8x512xf32>
    %27 = vector.broadcast %2 : vector<1x512xf32> to vector<8x512xf32>
    %28 = arith.addf %26, %27 : vector<8x512xf32>
    %cst_18 = arith.constant 0.000000e+00 : f32
    %29 = vector.broadcast %cst_18 : f32 to vector<8x512xf32>
    %30 = arith.maximumf %28, %29 : vector<8x512xf32>
    %31 = arith.truncf %30 : vector<8x512xf32> to vector<8x512xbf16>
    %c0_19 = arith.constant 0 : index
    %c0_20 = arith.constant 0 : index
    %32 = vector.load %arg6[%c0_19, %c0_20] : memref<512x896xbf16, #tpu.memory_space<vmem>>, vector<512x896xbf16>
    %cst_21 = arith.constant dense<0.000000e+00> : vector<8x896xf32>
    %33 = tpu.matmul %31, %32, %cst_21 {dimension_numbers = #tpu.dot_dimension_numbers<[1], [0], [0], [1], [0, 0, 1, 1], [], []>} : vector<8x512xbf16>, vector<512x896xbf16>, vector<8x896xf32> -> vector<8x896xf32>
    %34 = vector.broadcast %3 : vector<1x896xf32> to vector<8x896xf32>
    %35 = arith.addf %33, %34 : vector<8x896xf32>
    %36 = arith.negf %35 : vector<8x896xf32>
    %37 = math.exp %36 : vector<8x896xf32>
    %cst_22 = arith.constant 1.000000e+00 : f32
    %38 = vector.broadcast %cst_22 : f32 to vector<8x896xf32>
    %39 = arith.addf %38, %37 : vector<8x896xf32>
    %40 = arith.divf %38, %39 : vector<8x896xf32>
    %41 = arith.truncf %40 : vector<8x896xf32> to vector<8x896xbf16>
    %c0_23 = arith.constant 0 : index
    %c0_24 = arith.constant 0 : index
    %42 = vector.load %arg8[%c0_23, %c0_24] : memref<8x896xbf16, #tpu.memory_space<vmem>>, vector<8x896xbf16>
    tpu.vector_store %arg8[%c0_23, %c0_24], %41 {strides = array<i32>} : memref<8x896xbf16, #tpu.memory_space<vmem>>, vector<8x896xbf16>,
    %43 = arith.truncf %15 : vector<8x256xf32> to vector<8x256xbf16>
    %c0_25 = arith.constant 0 : index
    %c0_26 = arith.constant 0 : index
    %44 = vector.load %arg9[%c0_25, %c0_26] : memref<8x256xbf16, #tpu.memory_space<vmem>>, vector<8x256xbf16>
    tpu.vector_store %arg9[%c0_25, %c0_26], %43 {strides = array<i32>} : memref<8x256xbf16, #tpu.memory_space<vmem>>, vector<8x256xbf16>,
    return
  }
  func.func @transform_0(%arg0: i32) -> (i32, i32) {
    %c0_i32 = arith.constant 0 : i32
    %c0_i32_0 = arith.constant 0 : i32
    return %arg0, %c0_i32 : i32, i32
  }
  func.func @transform_1(%arg0: i32) -> (i32, i32) {
    %c0_i32 = arith.constant 0 : i32
    %c0_i32_0 = arith.constant 0 : i32
    return %arg0, %c0_i32 : i32, i32
  }
  func.func @transform_2(%arg0: i32) -> (i32, i32) {
    %c0_i32 = arith.constant 0 : i32
    %c0_i32_0 = arith.constant 0 : i32
    %c0_i32_1 = arith.constant 0 : i32
    return %c0_i32, %c0_i32_0 : i32, i32
  }
  func.func @transform_3(%arg0: i32) -> (i32, i32) {
    %c0_i32 = arith.constant 0 : i32
    %c0_i32_0 = arith.constant 0 : i32
    %c0_i32_1 = arith.constant 0 : i32
    return %c0_i32, %c0_i32_0 : i32, i32
  }
  func.func @transform_4(%arg0: i32) -> (i32, i32) {
    %c0_i32 = arith.constant 0 : i32
    %c0_i32_0 = arith.constant 0 : i32
    %c0_i32_1 = arith.constant 0 : i32
    return %c0_i32, %c0_i32_0 : i32, i32
  }
  func.func @transform_5(%arg0: i32) -> (i32, i32) {
    %c0_i32 = arith.constant 0 : i32
    %c0_i32_0 = arith.constant 0 : i32
    %c0_i32_1 = arith.constant 0 : i32
    return %c0_i32, %c0_i32_0 : i32, i32
  }
  func.func @transform_6(%arg0: i32) -> (i32, i32) {
    %c0_i32 = arith.constant 0 : i32
    %c0_i32_0 = arith.constant 0 : i32
    %c0_i32_1 = arith.constant 0 : i32
    return %c0_i32, %c0_i32_0 : i32, i32
  }
  func.func @transform_7(%arg0: i32) -> (i32, i32) {
    %c0_i32 = arith.constant 0 : i32
    %c0_i32_0 = arith.constant 0 : i32
    return %arg0, %c0_i32 : i32, i32
  }
  func.func @transform_8(%arg0: i32) -> (i32, i32) {
    %c0_i32 = arith.constant 0 : i32
    %c0_i32_0 = arith.constant 0 : i32
    return %arg0, %c0_i32 : i32, i32
  }
}

</mosaic_0001>

<bundles_post_ra>
// kernel: vae_forward.1
= control target key start
LH: loop header
LB: loop body
LE: loop exit
PB: predicated region body
PF: predicated region fallthrough
CT: control target
= control target key end

     0   :  { %14 = vsyncpa [#allocation3], 0  ;;  %s6240_s0 = inlined_call_operand.vmem [shape: bf16[8,896], index: 0, kind: input, shape index: {}]   ;;  %s6241_s1 = inlined_call_operand.vmem [shape: f32[8,128], index: 1, kind: input, shape index: {}]   ;;  %s6242_s2 = inlined_call_operand.hbm [shape: bf16[896,512], index: 2, kind: input, shape index: {}]   ;;  %s6243_s3 = inlined_call_operand.hbm [shape: bf16[512,256], index: 3, kind: input, shape index: {}]   ;;  %s6244_s4 = inlined_call_operand.hbm [shape: bf16[128,512], index: 4, kind: input, shape index: {}]   ;;  %s6245_s5 = inlined_call_operand.hbm [shape: bf16[512,896], index: 5, kind: input, shape index: {}]   ;;  %s6246_s6 = inlined_call_operand.vmem [shape: f32[1,2176], index: 6, kind: input, shape index: {}]   ;;  %s6247_s7 = inlined_call_operand.vmem [shape: bf16[8,896], index: 7, kind: output, shape index: {0}]   ;;  %s6248_s8 = inlined_call_operand.vmem [shape: bf16[8,256], index: 8, kind: output, shape index: {1}]  }
   0x1   :  { %15 = vsyncpa [#allocation5], 0 }
   0x2   :  { %16 = vsyncpa [#allocation8], 0  ;;  %s6017_s27 = smov [#allocation4]  }
   0x3   :  { %s38_s28 = sshll.u32 %s6017_s27, 4  ;;  %s39_s28 = int_to_ptr.vmem [resolvable:$true] %s38_s28 }
   0x4   :  { %s5939_s29 = scalar_lea.vmem %s39_s28, 8192  ;;  %p5944_p1 = scmp.lt.s32.totalorder %s39_s28, %s39_s28 }
   0x5   :  { %p5940_p0 = scmp.ne.s32.totalorder %s39_s28, %s5939_s29  ;;  %p5945_p2 = scmp.lt.s32.totalorder %s5939_s29, %s5939_s29 }
   0x7   :  { %p5946_p3 = por %p5945_p2, %p5944_p1 }
   0x9   :  { %p5947_p4 = pnand %p5946_p3, %p5940_p0 }
   0xb   :  { %5950 = shalt.err (!%p5947_p4)
}
   0xc   :  { %s6018_s30 = smov 128   ;;  %s6019_s9 = smov 8  }
   0xd   :  { %44 = dma.hbm_to_vmem [thread:$0]  %s6243_s3, 8192, %s39_s28, [#allocation5], %s6018_s30, %s6018_s30, %s6019_s9  }
   0xe   :  { %s6020_s12 = smov [#allocation2]  }
   0xf   :  { %s26_s13 = sshll.u32 %s6020_s12, 4  ;;  %s27_s13 = int_to_ptr.vmem [resolvable:$true] %s26_s13 }
  0x10   :  { %s5959_s14 = scalar_lea.vmem %s27_s13, 28672  ;;  %p5964_p6 = scmp.lt.s32.totalorder %s27_s13, %s27_s13 }
  0x11   :  { %p5960_p5 = scmp.ne.s32.totalorder %s27_s13, %s5959_s14  ;;  %p5965_p7 = scmp.lt.s32.totalorder %s5959_s14, %s5959_s14 }
  0x13   :  { %p5966_p8 = por %p5965_p7, %p5964_p6 }
  0x15   :  { %p5967_p9 = pnand %p5966_p8, %p5960_p5 }
  0x17   :  { %5970 = shalt.err (!%p5967_p9)
}
  0x18   :  { %s6021_s15 = smov 256   ;;  %s6022_s16 = smov 16  }
  0x19   :  { %32 = dma.hbm_to_vmem [thread:$0]  %s6242_s2, 28672, %s27_s13, [#allocation3], %s6021_s15, %s6021_s15, %s6022_s16  }
  0x1a   :  { %s6023_s19 = smov [#allocation6]   ;;  %s6024_s21 = smov [#allocation7]  }
  0x1b   :  { %s50_s20 = sshll.u32 %s6023_s19, 4  ;;  %s62_s3 = sshll.u32 %s6024_s21, 4  ;;  %s51_s20 = int_to_ptr.vmem [resolvable:$true] %s50_s20  ;;  %s63_s3 = int_to_ptr.vmem [resolvable:$true] %s62_s3 }
  0x1c   :  { %s5979_s22 = scalar_lea.vmem %s51_s20, 4096  ;;  %p5984_p11 = scmp.lt.s32.totalorder %s51_s20, %s51_s20 }
  0x1d   :  { %p5980_p10 = scmp.ne.s32.totalorder %s51_s20, %s5979_s22  ;;  %p5985_p12 = scmp.lt.s32.totalorder %s5979_s22, %s5979_s22 }
  0x1f   :  { %p5986_p13 = por %p5985_p12, %p5984_p11 }
  0x21   :  { %p5987_p0 = pnand %p5986_p13, %p5980_p10 }
  0x23   :  { %5990 = shalt.err (!%p5987_p0)
}
  0x24   :  { %56 = dma.hbm_to_vmem [thread:$0]  %s6244_s4, 4096, %s51_s20, [#allocation5], %s6021_s15, %s6021_s15, %s6022_s16  }
  0x25   :  { %s5999_s25 = scalar_lea.vmem %s63_s3, 28672  ;;  %p6004_p2 = scmp.lt.s32.totalorder %s63_s3, %s63_s3 }
  0x26   :  { %p6000_p1 = scmp.ne.s32.totalorder %s63_s3, %s5999_s25  ;;  %p6005_p3 = scmp.lt.s32.totalorder %s5999_s25, %s5999_s25 }
  0x28   :  { %p6006_p4 = por %p6005_p3, %p6004_p2 }
  0x2a   :  { %p6007_p5 = pnand %p6006_p4, %p6000_p1 }
  0x2c   :  { %6010 = shalt.err (!%p6007_p5)
}
  0x2d   :  { %s6025_s2 = smov 448   ;;  %s6026_s26 = smov 28  }
  0x2e   :  { %68 = dma.hbm_to_vmem [thread:$0]  %s6245_s5, 28672, %s63_s3, [#allocation8], %s6025_s2, %s6025_s2, %s6026_s26  }
  0x2f   :  { %6011 = dma.done.wait [#allocation3], 28672  }
  0x30   :  { %6012 = vsyncadd [#allocation3], 4294938624 }
  0x31   :  { %6013 = dma.done.wait [#allocation5], 12288  }
  0x32   :  { %6014 = vsyncadd [#allocation5], 4294955008 }
  0x33   :  { %6015 = dma.done.wait [#allocation8], 28672  }
  0x34   :  { %6016 = vsyncadd [#allocation8], 4294938624  ;;  %v5093_v0 = vld [vmem:[#allocation2 + $0xe4] ss:$16 sps:$4 sm:$0xff]   ;;  %v5097_v2 = vld [vmem:[#allocation2 + $0xe0] ss:$16 sps:$4 sm:$0xff]  }
  0x35   :  { %v5095_v1 = vld [vmem:[#allocation2 + $0x2e4] ss:$16 sps:$4 sm:$0xff]   ;;  %1482 = vmatprep.subr.bf16.mxu0 %v5093_v0  ;;  %v5098_v3 = vld [vmem:[#allocation2 + $0x2e0] ss:$16 sps:$4 sm:$0xff]   ;;  %v89_v48 = vld [vmem:[%s6240_s0 + $0x8] sm:$0xff] }
  0x36   :  { %1523 = vmatprep.subr.bf16.mxu1 %v5095_v1  ;;  %v5099_v4 = vld [vmem:[#allocation2 + $0xc4] ss:$16 sps:$4 sm:$0xff]   ;;  %1483 = vmatpush1.bf16.msra.mxu0 %v5097_v2  ;;  %v5103_v6 = vld [vmem:[#allocation2 + $0xc0] ss:$16 sps:$4 sm:$0xff]   ;;  %v6093_v51 = vcombine.high %v89_v48, %v89_v48 }
  0x37   :  { %1524 = vmatpush1.bf16.msra.mxu1 %v5098_v3  ;;  %v5101_v5 = vld [vmem:[#allocation2 + $0x2c4] ss:$16 sps:$4 sm:$0xff]   ;;  %1484 = vmatprep.subr.bf16.mxu0 %v5099_v4  ;;  %v5104_v7 = vld [vmem:[#allocation2 + $0x2c0] ss:$16 sps:$4 sm:$0xff]  }
  0x38   :  { %1525 = vmatprep.subr.bf16.mxu1 %v5101_v5  ;;  %v5105_v8 = vld [vmem:[#allocation2 + $0xa4] ss:$16 sps:$4 sm:$0xff]   ;;  %v5109_v10 = vld [vmem:[#allocation2 + $0xa0] ss:$16 sps:$4 sm:$0xff]   ;;  %1555 = vmatprep.mubr.bf16.mxu1 %v6093_v51 }
  0x39   :  { %v5107_v9 = vld [vmem:[#allocation2 + $0x2a4] ss:$16 sps:$4 sm:$0xff]   ;;  %v5110_v11 = vld [vmem:[#allocation2 + $0x2a0] ss:$16 sps:$4 sm:$0xff]  }
  0x3a   :  { %1485 = vmatpush1.bf16.msra.mxu0 %v5103_v6  ;;  %v5111_v12 = vld [vmem:[#allocation2 + $0x84] ss:$16 sps:$4 sm:$0xff]   ;;  %v5115_v14 = vld [vmem:[#allocation2 + $0x80] ss:$16 sps:$4 sm:$0xff]  }
  0x3b   :  { %1526 = vmatpush1.bf16.msra.mxu1 %v5104_v7  ;;  %1486 = vmatprep.subr.bf16.mxu0 %v5105_v8  ;;  %v5113_v13 = vld [vmem:[#allocation2 + $0x284] ss:$16 sps:$4 sm:$0xff]   ;;  %v5116_v15 = vld [vmem:[#allocation2 + $0x280] ss:$16 sps:$4 sm:$0xff]   ;;  %v6099_v7 = vcombine.low %v89_v48, %v89_v48  ;;  %v5253_v48 = vld [vmem:[#allocation2 + $0xcc] ss:$16 sps:$4 sm:$0xff]  }
  0x3c   :  { %1527 = vmatprep.subr.bf16.mxu1 %v5107_v9  ;;  %v5117_v16 = vld [vmem:[#allocation2 + $0x64] ss:$16 sps:$4 sm:$0xff]   ;;  %v5121_v18 = vld [vmem:[#allocation2 + $0x60] ss:$16 sps:$4 sm:$0xff]  }
  0x3d   :  { %v5119_v17 = vld [vmem:[#allocation2 + $0x264] ss:$16 sps:$4 sm:$0xff]   ;;  %v5122_v19 = vld [vmem:[#allocation2 + $0x260] ss:$16 sps:$4 sm:$0xff]  }
  0x3e   :  { %1487 = vmatpush1.bf16.msra.mxu0 %v5109_v10  ;;  %v5123_v20 = vld [vmem:[#allocation2 + $0x44] ss:$16 sps:$4 sm:$0xff]   ;;  %v5127_v22 = vld [vmem:[#allocation2 + $0x40] ss:$16 sps:$4 sm:$0xff]  }
  0x3f   :  { %1528 = vmatpush1.bf16.msra.mxu1 %v5110_v11  ;;  %1488 = vmatprep.subr.bf16.mxu0 %v5111_v12  ;;  %v5125_v21 = vld [vmem:[#allocation2 + $0x244] ss:$16 sps:$4 sm:$0xff]   ;;  %v5128_v23 = vld [vmem:[#allocation2 + $0x240] ss:$16 sps:$4 sm:$0xff]  }
  0x40   :  { %1529 = vmatprep.subr.bf16.mxu1 %v5113_v13  ;;  %v5129_v24 = vld [vmem:[#allocation2 + $0x24] ss:$16 sps:$4 sm:$0xff]   ;;  %v5133_v26 = vld [vmem:[#allocation2 + $0x20] ss:$16 sps:$4 sm:$0xff]  }
  0x41   :  { %v5131_v25 = vld [vmem:[#allocation2 + $0x224] ss:$16 sps:$4 sm:$0xff]   ;;  %v5134_v27 = vld [vmem:[#allocation2 + $0x220] ss:$16 sps:$4 sm:$0xff]  }
  0x42   :  { %1489 = vmatpush1.bf16.msra.mxu0 %v5115_v14  ;;  %v5135_v28 = vld [vmem:[#allocation2 + $0x4] ss:$16 sps:$4 sm:$0xff]   ;;  %v5139_v30 = vld [vmem:[#allocation2] ss:$16 sps:$4 sm:$0xff]  }
  0x43   :  { %1530 = vmatpush1.bf16.msra.mxu1 %v5116_v15  ;;  %1490 = vmatprep.subr.bf16.mxu0 %v5117_v16  ;;  %v5137_v29 = vld [vmem:[#allocation2 + $0x204] ss:$16 sps:$4 sm:$0xff]   ;;  %v5140_v31 = vld [vmem:[#allocation2 + $0x200] ss:$16 sps:$4 sm:$0xff]   ;;  %v6027_v16 = vmov 0  }
  0x44   :  { %1531 = vmatprep.subr.bf16.mxu1 %v5119_v17  ;;  %v5141_v32 = vld [vmem:[#allocation2 + $0x1e4] ss:$16 sps:$4 sm:$0xff]   ;;  %v5145_v34 = vld [vmem:[#allocation2 + $0x1e0] ss:$16 sps:$4 sm:$0xff]  }
  0x45   :  { %v5143_v33 = vld [vmem:[#allocation2 + $0x3e4] ss:$16 sps:$4 sm:$0xff]   ;;  %v5146_v35 = vld [vmem:[#allocation2 + $0x3e0] ss:$16 sps:$4 sm:$0xff]  }
  0x46   :  { %1491 = vmatpush1.bf16.msra.mxu0 %v5121_v18  ;;  %v5147_v36 = vld [vmem:[#allocation2 + $0x1c4] ss:$16 sps:$4 sm:$0xff]   ;;  %v5151_v38 = vld [vmem:[#allocation2 + $0x1c0] ss:$16 sps:$4 sm:$0xff]  }
  0x47   :  { %1532 = vmatpush1.bf16.msra.mxu1 %v5122_v19  ;;  %1492 = vmatprep.subr.bf16.mxu0 %v5123_v20  ;;  %v5149_v37 = vld [vmem:[#allocation2 + $0x3c4] ss:$16 sps:$4 sm:$0xff]   ;;  %v5152_v39 = vld [vmem:[#allocation2 + $0x3c0] ss:$16 sps:$4 sm:$0xff]  }
  0x48   :  { %1533 = vmatprep.subr.bf16.mxu1 %v5125_v21  ;;  %v5153_v40 = vld [vmem:[#allocation2 + $0x1a4] ss:$16 sps:$4 sm:$0xff]   ;;  %v5157_v42 = vld [vmem:[#allocation2 + $0x1a0] ss:$16 sps:$4 sm:$0xff]  }
  0x49   :  { %v5155_v41 = vld [vmem:[#allocation2 + $0x3a4] ss:$16 sps:$4 sm:$0xff]   ;;  %v5158_v43 = vld [vmem:[#allocation2 + $0x3a0] ss:$16 sps:$4 sm:$0xff]  }
  0x4a   :  { %1493 = vmatpush1.bf16.msra.mxu0 %v5127_v22  ;;  %v5159_v44 = vld [vmem:[#allocation2 + $0x184] ss:$16 sps:$4 sm:$0xff]   ;;  %v5163_v49 = vld [vmem:[#allocation2 + $0x180] ss:$16 sps:$4 sm:$0xff]  }
  0x4b   :  { %1534 = vmatpush1.bf16.msra.mxu1 %v5128_v23  ;;  %1494 = vmatprep.subr.bf16.mxu0 %v5129_v24  ;;  %v5161_v45 = vld [vmem:[#allocation2 + $0x384] ss:$16 sps:$4 sm:$0xff]   ;;  %v5164_v50 = vld [vmem:[#allocation2 + $0x380] ss:$16 sps:$4 sm:$0xff]  }
  0x4c   :  { %1535 = vmatprep.subr.bf16.mxu1 %v5131_v25  ;;  %v88_v46 = vld [vmem:[%s6240_s0] sm:$0xff] }
  0x4d   :  { %v6088_v47 = vcombine.high %v88_v46, %v88_v46  ;;  %v5165_v52 = vld [vmem:[#allocation2 + $0x164] ss:$16 sps:$4 sm:$0xff]   ;;  %v5169_v54 = vld [vmem:[#allocation2 + $0x160] ss:$16 sps:$4 sm:$0xff]   ;;  %v6097_v6 = vcombine.low %v88_v46, %v88_v46 }
  0x4e   :  { %1495 = vmatpush1.bf16.msra.mxu0 %v5133_v26  ;;  %v5167_v53 = vld [vmem:[#allocation2 + $0x364] ss:$16 sps:$4 sm:$0xff]   ;;  %v5170_v55 = vld [vmem:[#allocation2 + $0x360] ss:$16 sps:$4 sm:$0xff]  }
  0x4f   :  { %1536 = vmatpush1.bf16.msra.mxu1 %v5134_v27  ;;  %1496 = vmatprep.subr.bf16.mxu0 %v5135_v28  ;;  %v5171_v56 = vld [vmem:[#allocation2 + $0x144] ss:$16 sps:$4 sm:$0xff]   ;;  %v5175_v58 = vld [vmem:[#allocation2 + $0x140] ss:$16 sps:$4 sm:$0xff]  }
  0x50   :  { %1537 = vmatprep.subr.bf16.mxu1 %v5137_v29  ;;  %1514 = vmatprep.mubr.bf16.mxu0 %v6088_v47  ;;  %v5173_v57 = vld [vmem:[#allocation2 + $0x344] ss:$16 sps:$4 sm:$0xff]   ;;  %v5176_v59 = vld [vmem:[#allocation2 + $0x340] ss:$16 sps:$4 sm:$0xff]  }
  0x51   :  { %v5177_v60 = vld [vmem:[#allocation2 + $0x124] ss:$16 sps:$4 sm:$0xff]   ;;  %v5181_v62 = vld [vmem:[#allocation2 + $0x120] ss:$16 sps:$4 sm:$0xff]  }
  0x52   :  { %1497 = vmatpush1.bf16.msra.mxu0 %v5139_v30  ;;  %v5179_v61 = vld [vmem:[#allocation2 + $0x324] ss:$16 sps:$4 sm:$0xff]   ;;  %v5182_v63 = vld [vmem:[#allocation2 + $0x320] ss:$16 sps:$4 sm:$0xff]  }
  0x53   :  { %1538 = vmatpush1.bf16.msra.mxu1 %v5140_v31  ;;  %1498 = vmatprep.subr.bf16.mxu0 %v5141_v32  ;;  %v5183_v0 = vld [vmem:[#allocation2 + $0x104] ss:$16 sps:$4 sm:$0xff]   ;;  %v5187_v2 = vld [vmem:[#allocation2 + $0x100] ss:$16 sps:$4 sm:$0xff]  }
  0x54   :  { %1539 = vmatprep.subr.bf16.mxu1 %v5143_v33  ;;  %v5185_v1 = vld [vmem:[#allocation2 + $0x304] ss:$16 sps:$4 sm:$0xff]   ;;  %v5188_v3 = vld [vmem:[#allocation2 + $0x300] ss:$16 sps:$4 sm:$0xff]  }
  0x55   :  { %v5195_v4 = vld [vmem:[#allocation2 + $0x4e4] ss:$16 sps:$4 sm:$0xff]   ;;  %v5193_v8 = vld [vmem:[#allocation2 + $0x4e0] ss:$16 sps:$4 sm:$0xff]  }
  0x56   :  { %1499 = vmatpush2.bf16.msra.mxu0 %v5145_v34  ;;  %v5198_v5 = vld [vmem:[#allocation2 + $0x6e4] ss:$16 sps:$4 sm:$0xff]   ;;  %v5196_v9 = vld [vmem:[#allocation2 + $0x6e0] ss:$16 sps:$4 sm:$0xff]  }
  0x57   :  { %1540 = vmatpush2.bf16.msra.mxu1 %v5146_v35  ;;  %1500 = vmatprep.subr.bf16.mxu0 %v5147_v36  ;;  %v5201_v10 = vld [vmem:[#allocation2 + $0x4c4] ss:$16 sps:$4 sm:$0xff]   ;;  %v5199_v12 = vld [vmem:[#allocation2 + $0x4c0] ss:$16 sps:$4 sm:$0xff]  }
  0x58   :  { %1541 = vmatprep.subr.bf16.mxu1 %v5149_v37  ;;  %v5204_v11 = vld [vmem:[#allocation2 + $0x6c4] ss:$16 sps:$4 sm:$0xff]   ;;  %v5202_v13 = vld [vmem:[#allocation2 + $0x6c0] ss:$16 sps:$4 sm:$0xff]  }
  0x59   :  { %v5207_v14 = vld [vmem:[#allocation2 + $0x4a4] ss:$16 sps:$4 sm:$0xff]   ;;  %v5205_v17 = vld [vmem:[#allocation2 + $0x4a0] ss:$16 sps:$4 sm:$0xff]  }
  0x5a   :  { %1501 = vmatpush2.bf16.msra.mxu0 %v5151_v38  ;;  %v5210_v15 = vld [vmem:[#allocation2 + $0x6a4] ss:$16 sps:$4 sm:$0xff]   ;;  %v5208_v18 = vld [vmem:[#allocation2 + $0x6a0] ss:$16 sps:$4 sm:$0xff]  }
  0x5b   :  { %1542 = vmatpush2.bf16.msra.mxu1 %v5152_v39  ;;  %1502 = vmatprep.subr.bf16.mxu0 %v5153_v40  ;;  %v5213_v19 = vld [vmem:[#allocation2 + $0x484] ss:$16 sps:$4 sm:$0xff]   ;;  %v5211_v21 = vld [vmem:[#allocation2 + $0x480] ss:$16 sps:$4 sm:$0xff]  }
  0x5c   :  { %1543 = vmatprep.subr.bf16.mxu1 %v5155_v41  ;;  %v5216_v20 = vld [vmem:[#allocation2 + $0x684] ss:$16 sps:$4 sm:$0xff]   ;;  %v5214_v22 = vld [vmem:[#allocation2 + $0x680] ss:$16 sps:$4 sm:$0xff]  }
  0x5d   :  { %v5219_v23 = vld [vmem:[#allocation2 + $0x464] ss:$16 sps:$4 sm:$0xff]   ;;  %v5217_v25 = vld [vmem:[#allocation2 + $0x460] ss:$16 sps:$4 sm:$0xff]  }
  0x5e   :  { %1503 = vmatpush2.bf16.msra.mxu0 %v5157_v42  ;;  %v5222_v24 = vld [vmem:[#allocation2 + $0x664] ss:$16 sps:$4 sm:$0xff]   ;;  %v5220_v26 = vld [vmem:[#allocation2 + $0x660] ss:$16 sps:$4 sm:$0xff]   ;;  %v5247_v42 = vld [vmem:[#allocation2 + $0xec] ss:$16 sps:$4 sm:$0xff]  }
  0x5f   :  { %1544 = vmatpush2.bf16.msra.mxu1 %v5158_v43  ;;  %1504 = vmatprep.subr.bf16.mxu0 %v5159_v44  ;;  %v5225_v27 = vld [vmem:[#allocation2 + $0x444] ss:$16 sps:$4 sm:$0xff]   ;;  %v5223_v29 = vld [vmem:[#allocation2 + $0x440] ss:$16 sps:$4 sm:$0xff]   ;;  %v5244_v44 = vld [vmem:[%s6240_s0 + $0x18] ss:$0 sps:$4 sm:$0xff]  }
  0x60   :  { %1545 = vmatprep.subr.bf16.mxu1 %v5161_v45  ;;  %v5228_v28 = vld [vmem:[#allocation2 + $0x644] ss:$16 sps:$4 sm:$0xff]   ;;  %v5226_v30 = vld [vmem:[#allocation2 + $0x640] ss:$16 sps:$4 sm:$0xff]   ;;  %v5245_v45 = vld [vmem:[#allocation2 + $0xe8] ss:$16 sps:$4 sm:$0xff]  }
  0x61   :  { %v5231_v31 = vld [vmem:[#allocation2 + $0x424] ss:$16 sps:$4 sm:$0xff]   ;;  %v5229_v34 = vld [vmem:[#allocation2 + $0x420] ss:$16 sps:$4 sm:$0xff]  }
  0x62   :  { %1505 = vmatpush2.bf16.msra.mxu0 %v5163_v49  ;;  %v5234_v32 = vld [vmem:[#allocation2 + $0x624] ss:$16 sps:$4 sm:$0xff]   ;;  %v5232_v36 = vld [vmem:[#allocation2 + $0x620] ss:$16 sps:$4 sm:$0xff]  }
  0x63   :  { %1546 = vmatpush2.bf16.msra.mxu1 %v5164_v50  ;;  %1506 = vmatprep.subr.bf16.mxu0 %v5165_v52  ;;  %v6107_v33 = vld [vmem:[%s6240_s0 + $0x10] sm:$0xff]  ;;  %v5251_v50 = vld [vmem:[#allocation2 + $0xc8] ss:$16 sps:$4 sm:$0xff]  }
  0x64   :  { %1547 = vmatprep.subr.bf16.mxu1 %v5167_v53  ;;  %v6111_v35 = vcombine.high %v6107_v33, %v6107_v33  ;;  %v5237_v37 = vld [vmem:[#allocation2 + $0x404] ss:$16 sps:$4 sm:$0xff]   ;;  %v5235_v39 = vld [vmem:[#allocation2 + $0x400] ss:$16 sps:$4 sm:$0xff]   ;;  %v5259_v53 = vld [vmem:[#allocation2 + $0xac] ss:$16 sps:$4 sm:$0xff]  }
  0x65   :  { %v5240_v38 = vld [vmem:[#allocation2 + $0x604] ss:$16 sps:$4 sm:$0xff]   ;;  %v5238_v40 = vld [vmem:[#allocation2 + $0x600] ss:$16 sps:$4 sm:$0xff]  }
  0x66   :  { %1507 = vmatpush2.bf16.msra.mxu0 %v5169_v54  ;;  %v5243_v41 = vld [vmem:[#allocation2 + $0x5e4] ss:$16 sps:$4 sm:$0xff]   ;;  %v5241_v43 = vld [vmem:[#allocation2 + $0x5e0] ss:$16 sps:$4 sm:$0xff]  }
  0x67   :  { %1548 = vmatpush2.bf16.msra.mxu1 %v5170_v55  ;;  %1508 = vmatprep.subr.bf16.mxu0 %v5171_v56  ;;  %v5250_v46 = vld [vmem:[#allocation2 + $0x5c4] ss:$16 sps:$4 sm:$0xff]   ;;  %v5248_v49 = vld [vmem:[#allocation2 + $0x5c0] ss:$16 sps:$4 sm:$0xff]   ;;  %v5257_v55 = vld [vmem:[#allocation2 + $0xa8] ss:$16 sps:$4 sm:$0xff]  }
  0x68   :  { %1549 = vmatprep.subr.bf16.mxu1 %v5173_v57  ;;  %v5256_v52 = vld [vmem:[#allocation2 + $0x5a4] ss:$16 sps:$4 sm:$0xff]   ;;  %v5254_v54 = vld [vmem:[#allocation2 + $0x5a0] ss:$16 sps:$4 sm:$0xff]   ;;  %v5265_v57 = vld [vmem:[#allocation2 + $0x8c] ss:$16 sps:$4 sm:$0xff]  }
  0x69   :  { %v5262_v56 = vld [vmem:[#allocation2 + $0x584] ss:$16 sps:$4 sm:$0xff]  }
  0x6a   :  { %1509 = vmatpush2.bf16.msra.mxu0 %v5175_v58  ;;  %v5260_v58 = vld [vmem:[#allocation2 + $0x580] ss:$16 sps:$4 sm:$0xff]  }
  0x6b   :  { %1550 = vmatpush2.bf16.msra.mxu1 %v5176_v59  ;;  %1510 = vmatprep.subr.bf16.mxu0 %v5177_v60  ;;  %v5263_v59 = vld [vmem:[#allocation2 + $0x88] ss:$16 sps:$4 sm:$0xff]   ;;  %v5268_v60 = vld [vmem:[#allocation2 + $0x564] ss:$16 sps:$4 sm:$0xff]  }
  0x6c   :  { %1551 = vmatprep.subr.bf16.mxu1 %v5179_v61  ;;  %v5271_v61 = vld [vmem:[#allocation2 + $0x6c] ss:$16 sps:$4 sm:$0xff]  }
  0x6e   :  { %1511 = vmatpush2.bf16.msra.mxu0 %v5181_v62  ;;  %v5266_v62 = vld [vmem:[#allocation2 + $0x560] ss:$16 sps:$4 sm:$0xff]  }
  0x6f   :  { %1552 = vmatpush2.bf16.msra.mxu1 %v5182_v63  ;;  %1512 = vmatprep.subr.bf16.mxu0 %v5183_v0  ;;  %v5274_v63 = vld [vmem:[#allocation2 + $0x544] ss:$16 sps:$4 sm:$0xff]   ;;  %v5277_v0 = vld [vmem:[#allocation2 + $0x4c] ss:$16 sps:$4 sm:$0xff]  }
  0x70   :  { %1553 = vmatprep.subr.bf16.mxu1 %v5185_v1  ;;  %v5272_v1 = vld [vmem:[#allocation2 + $0x540] ss:$16 sps:$4 sm:$0xff]  }
  0x72   :  { %1513 = vmatpush2.bf16.msra.mxu0 %v5187_v2  ;;  %v5275_v2 = vld [vmem:[#allocation2 + $0x48] ss:$16 sps:$4 sm:$0xff]  }
  0x73   :  { %1554 = vmatpush2.bf16.msra.mxu1 %v5188_v3  ;;  %1564 = vmatprep.subr.bf16.mxu0 %v5195_v4  ;;  %v5280_v3 = vld [vmem:[#allocation2 + $0x524] ss:$16 sps:$4 sm:$0xff]   ;;  %v5283_v4 = vld [vmem:[#allocation2 + $0x2c] ss:$16 sps:$4 sm:$0xff]  }
  0x74   :  { %1605 = vmatprep.subr.bf16.mxu1 %v5198_v5  ;;  %v5278_v5 = vld [vmem:[#allocation2 + $0x520] ss:$16 sps:$4 sm:$0xff]  }
  0x75   :  { %1515 = vmatmul.mubr.bf16.vlgmr.msra.gmra.mxu0 %v6097_v6 }
  0x76   :  { %1556 = vmatmul.mubr.bf16.vlgmr.msra.gmra.mxu1 %v6099_v7  ;;  %1565 = vmatpush1.bf16.msra.mxu0 %v5193_v8  ;;  %v5281_v8 = vld [vmem:[#allocation2 + $0x28] ss:$16 sps:$4 sm:$0xff]  }
  0x77   :  { %1606 = vmatpush1.bf16.msra.mxu1 %v5196_v9  ;;  %1566 = vmatprep.subr.bf16.mxu0 %v5201_v10  ;;  %v5286_v9 = vld [vmem:[#allocation2 + $0x504] ss:$16 sps:$4 sm:$0xff]   ;;  %v5289_v10 = vld [vmem:[#allocation2 + $0xc] ss:$16 sps:$4 sm:$0xff]  }
  0x78   :  { %1607 = vmatprep.subr.bf16.mxu1 %v5204_v11  ;;  %1637 = vmatprep.mubr.bf16.mxu1 %v6027_v16  ;;  %v5284_v11 = vld [vmem:[#allocation2 + $0x500] ss:$16 sps:$4 sm:$0xff]  }
  0x79   :  { %1596 = vmatprep.mubr.bf16.mxu0 %v6111_v35 }
  0x7a   :  { %1567 = vmatpush1.bf16.msra.mxu0 %v5199_v12  ;;  %v5287_v12 = vld [vmem:[#allocation2 + $0x8] ss:$16 sps:$4 sm:$0xff]  }
  0x7b   :  { %1608 = vmatpush1.bf16.msra.mxu1 %v5202_v13  ;;  %1568 = vmatprep.subr.bf16.mxu0 %v5207_v14  ;;  %v5294_v13 = vld [vmem:[#allocation2 + $0x1ec] ss:$16 sps:$4 sm:$0xff]  }
  0x7c   :  { %1609 = vmatprep.subr.bf16.mxu1 %v5210_v15  ;;  %v5297_v14 = vld [vmem:[#allocation2 + $0x2ec] ss:$16 sps:$4 sm:$0xff]   ;;  %v6120_v15 = vcombine.low %v6107_v33, %v6107_v33  ;;  %v5316_v33 = vld [vmem:[#allocation2 + $0x168] ss:$16 sps:$4 sm:$0xff]  }
  0x7e   :  { %1569 = vmatpush1.bf16.msra.mxu0 %v5205_v17  ;;  %v5292_v17 = vld [vmem:[#allocation2 + $0x1e8] ss:$16 sps:$4 sm:$0xff]  }
  0x7f   :  { %1610 = vmatpush1.bf16.msra.mxu1 %v5208_v18  ;;  %1570 = vmatprep.subr.bf16.mxu0 %v5213_v19  ;;  %v5295_v18 = vld [vmem:[#allocation2 + $0x2e8] ss:$16 sps:$4 sm:$0xff]   ;;  %v5300_v19 = vld [vmem:[#allocation2 + $0x1cc] ss:$16 sps:$4 sm:$0xff]  }
  0x80   :  { %1611 = vmatprep.subr.bf16.mxu1 %v5216_v20  ;;  %v5303_v20 = vld [vmem:[#allocation2 + $0x2cc] ss:$16 sps:$4 sm:$0xff]  }
  0x82   :  { %1571 = vmatpush1.bf16.msra.mxu0 %v5211_v21  ;;  %v5298_v21 = vld [vmem:[#allocation2 + $0x1c8] ss:$16 sps:$4 sm:$0xff]  }
  0x83   :  { %1612 = vmatpush1.bf16.msra.mxu1 %v5214_v22  ;;  %1572 = vmatprep.subr.bf16.mxu0 %v5219_v23  ;;  %v5301_v22 = vld [vmem:[#allocation2 + $0x2c8] ss:$16 sps:$4 sm:$0xff]   ;;  %v5306_v23 = vld [vmem:[#allocation2 + $0x1ac] ss:$16 sps:$4 sm:$0xff]  }
  0x84   :  { %1613 = vmatprep.subr.bf16.mxu1 %v5222_v24  ;;  %v5309_v24 = vld [vmem:[#allocation2 + $0x2ac] ss:$16 sps:$4 sm:$0xff]  }
  0x86   :  { %1573 = vmatpush1.bf16.msra.mxu0 %v5217_v25  ;;  %v5304_v25 = vld [vmem:[#allocation2 + $0x1a8] ss:$16 sps:$4 sm:$0xff]  }
  0x87   :  { %1614 = vmatpush1.bf16.msra.mxu1 %v5220_v26  ;;  %1574 = vmatprep.subr.bf16.mxu0 %v5225_v27  ;;  %v5307_v26 = vld [vmem:[#allocation2 + $0x2a8] ss:$16 sps:$4 sm:$0xff]   ;;  %v5312_v27 = vld [vmem:[#allocation2 + $0x18c] ss:$16 sps:$4 sm:$0xff]  }
  0x88   :  { %1615 = vmatprep.subr.bf16.mxu1 %v5228_v28  ;;  %v5315_v28 = vld [vmem:[#allocation2 + $0x28c] ss:$16 sps:$4 sm:$0xff]  }
  0x8a   :  { %1575 = vmatpush1.bf16.msra.mxu0 %v5223_v29  ;;  %v5310_v29 = vld [vmem:[#allocation2 + $0x188] ss:$16 sps:$4 sm:$0xff]  }
  0x8b   :  { %1616 = vmatpush1.bf16.msra.mxu1 %v5226_v30  ;;  %1576 = vmatprep.subr.bf16.mxu0 %v5231_v31  ;;  %v5313_v30 = vld [vmem:[#allocation2 + $0x288] ss:$16 sps:$4 sm:$0xff]   ;;  %v5318_v31 = vld [vmem:[#allocation2 + $0x16c] ss:$16 sps:$4 sm:$0xff]  }
  0x8c   :  { %1617 = vmatprep.subr.bf16.mxu1 %v5234_v32  ;;  %v5321_v32 = vld [vmem:[#allocation2 + $0x26c] ss:$16 sps:$4 sm:$0xff]  }
  0x8e   :  { %1577 = vmatpush1.bf16.msra.mxu0 %v5229_v34  ;;  %v5324_v34 = vld [vmem:[#allocation2 + $0x14c] ss:$16 sps:$4 sm:$0xff]  }
  0x8f   :  { %1618 = vmatpush1.bf16.msra.mxu1 %v5232_v36  ;;  %1578 = vmatprep.subr.bf16.mxu0 %v5237_v37  ;;  %v5327_v36 = vld [vmem:[#allocation2 + $0x24c] ss:$16 sps:$4 sm:$0xff]   ;;  %v5322_v37 = vld [vmem:[#allocation2 + $0x148] ss:$16 sps:$4 sm:$0xff]  }
  0x90   :  { %1619 = vmatprep.subr.bf16.mxu1 %v5240_v38  ;;  %v5325_v38 = vld [vmem:[#allocation2 + $0x248] ss:$16 sps:$4 sm:$0xff]  }
  0x92   :  { %1579 = vmatpush1.bf16.msra.mxu0 %v5235_v39  ;;  %v5330_v39 = vld [vmem:[#allocation2 + $0x12c] ss:$16 sps:$4 sm:$0xff]  }
  0x93   :  { %1620 = vmatpush1.bf16.msra.mxu1 %v5238_v40  ;;  %1580 = vmatprep.subr.bf16.mxu0 %v5243_v41  ;;  %v5333_v40 = vld [vmem:[#allocation2 + $0x22c] ss:$16 sps:$4 sm:$0xff]   ;;  %v5328_v41 = vld [vmem:[#allocation2 + $0x128] ss:$16 sps:$4 sm:$0xff]  }
  0x94   :  { %1646 = vmatprep.subr.bf16.mxu1 %v5247_v42  ;;  %v5331_v42 = vld [vmem:[#allocation2 + $0x228] ss:$16 sps:$4 sm:$0xff]  }
  0x96   :  { %1638 = vmatmul.mubr.bf16.vlgmr.msra.gmra.mxu1 %v5244_v44  ;;  %1581 = vmatpush2.bf16.msra.mxu0 %v5241_v43  ;;  %v5336_v43 = vld [vmem:[#allocation2 + $0x10c] ss:$16 sps:$4 sm:$0xff]  }
  0x97   :  { %1647 = vmatpush1.bf16.msra.mxu1 %v5245_v45  ;;  %1582 = vmatprep.subr.bf16.mxu0 %v5250_v46  ;;  %v5339_v44 = vld [vmem:[#allocation2 + $0x20c] ss:$16 sps:$4 sm:$0xff]   ;;  %v5334_v45 = vld [vmem:[#allocation2 + $0x108] ss:$16 sps:$4 sm:$0xff]  }
  0x98   :  { %1648 = vmatprep.subr.bf16.mxu1 %v5253_v48  ;;  %1678 = vmatprep.mubr.bf16.mxu1 %v6088_v47  ;;  %v5269_v47 = vld [vmem:[#allocation2 + $0x68] ss:$16 sps:$4 sm:$0xff]   ;;  %v5342_v48 = vld [vmem:[#allocation2 + $0x3ec] ss:$16 sps:$4 sm:$0xff]  }
  0x99   :  { %v5337_v46 = vld [vmem:[#allocation2 + $0x208] ss:$16 sps:$4 sm:$0xff]  }
  0x9a   :  { %1583 = vmatpush2.bf16.msra.mxu0 %v5248_v49  ;;  %v5345_v49 = vld [vmem:[#allocation2 + $0x4ec] ss:$16 sps:$4 sm:$0xff]  }
  0x9b   :  { %1649 = vmatpush1.bf16.msra.mxu1 %v5251_v50  ;;  %1584 = vmatprep.subr.bf16.mxu0 %v5256_v52  ;;  %v5340_v50 = vld [vmem:[#allocation2 + $0x3e8] ss:$16 sps:$4 sm:$0xff]  }
  0x9c   :  { %1650 = vmatprep.subr.bf16.mxu1 %v5259_v53  ;;  %v5343_v52 = vld [vmem:[#allocation2 + $0x4e8] ss:$16 sps:$4 sm:$0xff]   ;;  %v5348_v53 = vld [vmem:[#allocation2 + $0x3cc] ss:$16 sps:$4 sm:$0xff]  }
  0x9e   :  { %1585 = vmatpush2.bf16.msra.mxu0 %v5254_v54  ;;  %v5351_v54 = vld [vmem:[#allocation2 + $0x4cc] ss:$16 sps:$4 sm:$0xff]  }
  0x9f   :  { %1651 = vmatpush1.bf16.msra.mxu1 %v5257_v55  ;;  %1586 = vmatprep.subr.bf16.mxu0 %v5262_v56  ;;  %v5346_v55 = vld [vmem:[#allocation2 + $0x3c8] ss:$16 sps:$4 sm:$0xff]  }
  0xa0   :  { %1652 = vmatprep.subr.bf16.mxu1 %v5265_v57  ;;  %v5349_v56 = vld [vmem:[#allocation2 + $0x4c8] ss:$16 sps:$4 sm:$0xff]   ;;  %v5354_v57 = vld [vmem:[#allocation2 + $0x3ac] ss:$16 sps:$4 sm:$0xff]  }
  0xa2   :  { %1587 = vmatpush2.bf16.msra.mxu0 %v5260_v58  ;;  %v5357_v58 = vld [vmem:[#allocation2 + $0x4ac] ss:$16 sps:$4 sm:$0xff]  }
  0xa3   :  { %1653 = vmatpush1.bf16.msra.mxu1 %v5263_v59  ;;  %1588 = vmatprep.subr.bf16.mxu0 %v5268_v60  ;;  %v5352_v59 = vld [vmem:[#allocation2 + $0x3a8] ss:$16 sps:$4 sm:$0xff]  }
  0xa4   :  { %1654 = vmatprep.subr.bf16.mxu1 %v5271_v61  ;;  %v5355_v60 = vld [vmem:[#allocation2 + $0x4a8] ss:$16 sps:$4 sm:$0xff]   ;;  %v5360_v61 = vld [vmem:[#allocation2 + $0x38c] ss:$16 sps:$4 sm:$0xff]  }
  0xa6   :  { %1589 = vmatpush2.bf16.msra.mxu0 %v5266_v62  ;;  %v5363_v62 = vld [vmem:[#allocation2 + $0x48c] ss:$16 sps:$4 sm:$0xff]  }
  0xa7   :  { %1655 = vmatpush1.bf16.msra.mxu1 %v5269_v47  ;;  %1590 = vmatprep.subr.bf16.mxu0 %v5274_v63  ;;  %v5358_v47 = vld [vmem:[#allocation2 + $0x388] ss:$16 sps:$4 sm:$0xff]   ;;  %v5366_v63 = vld [vmem:[#allocation2 + $0x36c] ss:$16 sps:$4 sm:$0xff]  }
  0xa8   :  { %1656 = vmatprep.subr.bf16.mxu1 %v5277_v0  ;;  %v5369_v0 = vld [vmem:[#allocation2 + $0x46c] ss:$16 sps:$4 sm:$0xff]  }
  0xaa   :  { %1591 = vmatpush2.bf16.msra.mxu0 %v5272_v1  ;;  %v5364_v1 = vld [vmem:[#allocation2 + $0x368] ss:$16 sps:$4 sm:$0xff]  }
  0xab   :  { %1657 = vmatpush1.bf16.msra.mxu1 %v5275_v2  ;;  %1592 = vmatprep.subr.bf16.mxu0 %v5280_v3  ;;  %v5367_v2 = vld [vmem:[#allocation2 + $0x468] ss:$16 sps:$4 sm:$0xff]   ;;  %v5372_v3 = vld [vmem:[#allocation2 + $0x34c] ss:$16 sps:$4 sm:$0xff]  }
  0xac   :  { %1658 = vmatprep.subr.bf16.mxu1 %v5283_v4  ;;  %v5375_v4 = vld [vmem:[#allocation2 + $0x44c] ss:$16 sps:$4 sm:$0xff]  }
  0xae   :  { %1593 = vmatpush2.bf16.msra.mxu0 %v5278_v5  ;;  %v5373_v5 = vld [vmem:[#allocation2 + $0x448] ss:$16 sps:$4 sm:$0xff]  }
  0xaf   :  { %1659 = vmatpush1.bf16.msra.mxu1 %v5281_v8  ;;  %1594 = vmatprep.subr.bf16.mxu0 %v5286_v9  ;;  %v5378_v8 = vld [vmem:[#allocation2 + $0x32c] ss:$16 sps:$4 sm:$0xff]  }
  0xb0   :  { %1660 = vmatprep.subr.bf16.mxu1 %v5289_v10  ;;  %v5381_v9 = vld [vmem:[#allocation2 + $0x42c] ss:$16 sps:$4 sm:$0xff]   ;;  %v5376_v10 = vld [vmem:[#allocation2 + $0x328] ss:$16 sps:$4 sm:$0xff]  }
  0xb2   :  { %1595 = vmatpush2.bf16.msra.mxu0 %v5284_v11  ;;  %v5379_v11 = vld [vmem:[#allocation2 + $0x428] ss:$16 sps:$4 sm:$0xff]  }
  0xb3   :  { %1661 = vmatpush1.bf16.msra.mxu1 %v5287_v12  ;;  %1687 = vmatprep.subr.bf16.mxu0 %v5297_v14  ;;  %v5384_v12 = vld [vmem:[#allocation2 + $0x30c] ss:$16 sps:$4 sm:$0xff]   ;;  %v5382_v14 = vld [vmem:[#allocation2 + $0x308] ss:$16 sps:$4 sm:$0xff]  }
  0xb4   :  { %1662 = vmatprep.subr.bf16.mxu1 %v5294_v13  ;;  %v5387_v13 = vld [vmem:[#allocation2 + $0x40c] ss:$16 sps:$4 sm:$0xff]  }
  0xb5   :  { %1597 = vmatmul.mubr.bf16.vlgmr.msra.gmra.mxu0 %v6120_v15 }
  0xb6   :  { %1688 = vmatpush1.bf16.msra.mxu0 %v5295_v18  ;;  %1719 = vmatprep.mubr.bf16.mxu0 %v6093_v51  ;;  %v5319_v51 = vld [vmem:[#allocation2 + $0x268] ss:$16 sps:$4 sm:$0xff]   ;;  %v5390_v18 = vld [vmem:[#allocation2 + $0x5ec] ss:$16 sps:$4 sm:$0xff]  }
  0xb7   :  { %1663 = vmatpush2.bf16.msra.mxu1 %v5292_v17  ;;  %1689 = vmatprep.subr.bf16.mxu0 %v5303_v20  ;;  %v5385_v17 = vld [vmem:[#allocation2 + $0x408] ss:$16 sps:$4 sm:$0xff]  }
  0xb8   :  { %1664 = vmatprep.subr.bf16.mxu1 %v5300_v19  ;;  %v5393_v19 = vld [vmem:[#allocation2 + $0x6ec] ss:$16 sps:$4 sm:$0xff]   ;;  %v5388_v20 = vld [vmem:[#allocation2 + $0x5e8] ss:$16 sps:$4 sm:$0xff]  }
  0xba   :  { %1690 = vmatpush1.bf16.msra.mxu0 %v5301_v22  ;;  %v5396_v22 = vld [vmem:[#allocation2 + $0x5cc] ss:$16 sps:$4 sm:$0xff]  }
  0xbb   :  { %1665 = vmatpush2.bf16.msra.mxu1 %v5298_v21  ;;  %1691 = vmatprep.subr.bf16.mxu0 %v5309_v24  ;;  %v5391_v21 = vld [vmem:[#allocation2 + $0x6e8] ss:$16 sps:$4 sm:$0xff]  }
  0xbc   :  { %1666 = vmatprep.subr.bf16.mxu1 %v5306_v23  ;;  %v5399_v23 = vld [vmem:[#allocation2 + $0x6cc] ss:$16 sps:$4 sm:$0xff]   ;;  %v5394_v24 = vld [vmem:[#allocation2 + $0x5c8] ss:$16 sps:$4 sm:$0xff]  }
  0xbe   :  { %1692 = vmatpush1.bf16.msra.mxu0 %v5307_v26  ;;  %v5402_v26 = vld [vmem:[#allocation2 + $0x5ac] ss:$16 sps:$4 sm:$0xff]  }
  0xbf   :  { %1667 = vmatpush2.bf16.msra.mxu1 %v5304_v25  ;;  %1693 = vmatprep.subr.bf16.mxu0 %v5315_v28  ;;  %v5397_v25 = vld [vmem:[#allocation2 + $0x6c8] ss:$16 sps:$4 sm:$0xff]  }
  0xc0   :  { %1668 = vmatprep.subr.bf16.mxu1 %v5312_v27  ;;  %v5405_v27 = vld [vmem:[#allocation2 + $0x6ac] ss:$16 sps:$4 sm:$0xff]   ;;  %v5400_v28 = vld [vmem:[#allocation2 + $0x5a8] ss:$16 sps:$4 sm:$0xff]  }
  0xc2   :  { %1694 = vmatpush1.bf16.msra.mxu0 %v5313_v30  ;;  %v5408_v30 = vld [vmem:[#allocation2 + $0x58c] ss:$16 sps:$4 sm:$0xff]  }
  0xc3   :  { %1669 = vmatpush2.bf16.msra.mxu1 %v5310_v29  ;;  %1695 = vmatprep.subr.bf16.mxu0 %v5321_v32  ;;  %v5403_v29 = vld [vmem:[#allocation2 + $0x6a8] ss:$16 sps:$4 sm:$0xff]  }
  0xc4   :  { %1670 = vmatprep.subr.bf16.mxu1 %v5318_v31  ;;  %v5411_v31 = vld [vmem:[#allocation2 + $0x68c] ss:$16 sps:$4 sm:$0xff]   ;;  %v5406_v32 = vld [vmem:[#allocation2 + $0x588] ss:$16 sps:$4 sm:$0xff]  }
  0xc6   :  { %1696 = vmatpush1.bf16.msra.mxu0 %v5319_v51  ;;  %v5414_v51 = vld [vmem:[#allocation2 + $0x56c] ss:$16 sps:$4 sm:$0xff]  }
  0xc7   :  { %1671 = vmatpush2.bf16.msra.mxu1 %v5316_v33  ;;  %1697 = vmatprep.subr.bf16.mxu0 %v5327_v36  ;;  %v5409_v33 = vld [vmem:[#allocation2 + $0x688] ss:$16 sps:$4 sm:$0xff]  }
  0xc8   :  { %1672 = vmatprep.subr.bf16.mxu1 %v5324_v34  ;;  %v5412_v34 = vld [vmem:[#allocation2 + $0x568] ss:$16 sps:$4 sm:$0xff]  }
  0xc9   :  { %v5415_v36 = vld [vmem:[#allocation2 + $0x668] ss:$16 sps:$4 sm:$0xff]  }
  0xca   :  { %1698 = vmatpush1.bf16.msra.mxu0 %v5325_v38  ;;  %v5423_v38 = vld [vmem:[#allocation2 + $0x64c] ss:$16 sps:$4 sm:$0xff]  }
  0xcb   :  { %1673 = vmatpush2.bf16.msra.mxu1 %v5322_v37  ;;  %1699 = vmatprep.subr.bf16.mxu0 %v5333_v40  ;;  %v5420_v37 = vld [vmem:[#allocation2 + $0x54c] ss:$16 sps:$4 sm:$0xff]   ;;  %v5421_v40 = vld [vmem:[#allocation2 + $0x648] ss:$16 sps:$4 sm:$0xff]  }
  0xcc   :  { %1674 = vmatprep.subr.bf16.mxu1 %v5330_v39  ;;  %v5418_v39 = vld [vmem:[#allocation2 + $0x548] ss:$16 sps:$4 sm:$0xff]  }
  0xce   :  { %1700 = vmatpush1.bf16.msra.mxu0 %v5331_v42  ;;  %v5429_v42 = vld [vmem:[#allocation2 + $0x62c] ss:$16 sps:$4 sm:$0xff]  }
  0xcf   :  { %1675 = vmatpush2.bf16.msra.mxu1 %v5328_v41  ;;  %1701 = vmatprep.subr.bf16.mxu0 %v5339_v44  ;;  %v5426_v41 = vld [vmem:[#allocation2 + $0x52c] ss:$16 sps:$4 sm:$0xff]   ;;  %v5427_v44 = vld [vmem:[#allocation2 + $0x628] ss:$16 sps:$4 sm:$0xff]  }
  0xd0   :  { %1676 = vmatprep.subr.bf16.mxu1 %v5336_v43  ;;  %v5424_v43 = vld [vmem:[#allocation2 + $0x528] ss:$16 sps:$4 sm:$0xff]  }
  0xd2   :  { %1702 = vmatpush1.bf16.msra.mxu0 %v5337_v46  ;;  %v5435_v46 = vld [vmem:[#allocation2 + $0x60c] ss:$16 sps:$4 sm:$0xff]  }
  0xd3   :  { %1677 = vmatpush2.bf16.msra.mxu1 %v5334_v45  ;;  %1703 = vmatprep.subr.bf16.mxu0 %v5342_v48  ;;  %v5432_v45 = vld [vmem:[#allocation2 + $0x50c] ss:$16 sps:$4 sm:$0xff]   ;;  %v5430_v48 = vld [vmem:[#allocation2 + $0x508] ss:$16 sps:$4 sm:$0xff]  }
  0xd4   :  { %1728 = vmatprep.subr.bf16.mxu1 %v5345_v49  ;;  %v5433_v49 = vld [vmem:[#allocation2 + $0x608] ss:$16 sps:$4 sm:$0xff]  }
  0xd6   :  { %1679 = vmatmul.mubr.bf16.vlgmr.msra.gmra.mxu1 %v6097_v6  ;;  %1704 = vmatpush2.bf16.msra.mxu0 %v5340_v50  ;;  %v5361_v6 = vld [vmem:[#allocation2 + $0x488] ss:$16 sps:$4 sm:$0xff]   ;;  %v5438_v50 = vld [vmem:[#allocation4 + $0x74] ss:$8 sps:$4 sm:$0xff]  }
  0xd7   :  { %1729 = vmatpush1.bf16.msra.mxu1 %v5343_v52  ;;  %1705 = vmatprep.subr.bf16.mxu0 %v5348_v53  ;;  %v5436_v52 = vld [vmem:[#allocation4 + $0x70] ss:$8 sps:$4 sm:$0xff]   ;;  %v5441_v53 = vld [vmem:[#allocation4 + $0x64] ss:$8 sps:$4 sm:$0xff]  }
  0xd8   :  { %1730 = vmatprep.subr.bf16.mxu1 %v5351_v54  ;;  %1760 = vmatprep.mubr.bf16.mxu1 %v6111_v35  ;;  %v5370_v35 = vld [vmem:[#allocation2 + $0x348] ss:$16 sps:$4 sm:$0xff]  }
  0xd9   :  { %v5439_v54 = vld [vmem:[#allocation4 + $0x60] ss:$8 sps:$4 sm:$0xff]  }
  0xda   :  { %1706 = vmatpush2.bf16.msra.mxu0 %v5346_v55  ;;  %v5930_v55 = vld [vmem:[%s6240_s0 + $0x18] ss:$0 sps:$4 sm:$0xff]  }
  0xdb   :  { %1731 = vmatpush1.bf16.msra.mxu1 %v5349_v56  ;;  %1707 = vmatprep.subr.bf16.mxu0 %v5354_v57  ;;  %v5444_v56 = vld [vmem:[#allocation4 + $0x54] ss:$8 sps:$4 sm:$0xff]   ;;  %v5442_v57 = vld [vmem:[#allocation4 + $0x50] ss:$8 sps:$4 sm:$0xff]  }
  0xdc   :  { %1732 = vmatprep.subr.bf16.mxu1 %v5357_v58  ;;  %v5447_v58 = vld [vmem:[#allocation4 + $0x44] ss:$8 sps:$4 sm:$0xff]  }
  0xde   :  { %1708 = vmatpush2.bf16.msra.mxu0 %v5352_v59  ;;  %v5484_v59 = vld [vmem:[#allocation4 + $0x170] ss:$8 sps:$4 sm:$0xff]  }
  0xdf   :  { %1733 = vmatpush1.bf16.msra.mxu1 %v5355_v60  ;;  %1709 = vmatprep.subr.bf16.mxu0 %v5360_v61  ;;  %v5486_v60 = vld [vmem:[#allocation4 + $0x174] ss:$8 sps:$4 sm:$0xff]   ;;  %v5489_v61 = vld [vmem:[#allocation4 + $0x164] ss:$8 sps:$4 sm:$0xff]  }
  0xe0   :  { %1734 = vmatprep.subr.bf16.mxu1 %v5363_v62  ;;  %v5445_v62 = vld [vmem:[#allocation4 + $0x40] ss:$8 sps:$4 sm:$0xff]  }
  0xe2   :  { %1710 = vmatpush2.bf16.msra.mxu0 %v5358_v47  ;;  %v5450_v47 = vld [vmem:[#allocation4 + $0x34] ss:$8 sps:$4 sm:$0xff]  }
  0xe3   :  { %1735 = vmatpush1.bf16.msra.mxu1 %v5361_v6  ;;  %1711 = vmatprep.subr.bf16.mxu0 %v5366_v63  ;;  %v5487_v6 = vld [vmem:[#allocation4 + $0x160] ss:$8 sps:$4 sm:$0xff]   ;;  %v5448_v63 = vld [vmem:[#allocation4 + $0x30] ss:$8 sps:$4 sm:$0xff]  }
  0xe4   :  { %1736 = vmatprep.subr.bf16.mxu1 %v5369_v0  ;;  %v5490_v0 = vld [vmem:[#allocation4 + $0x150] ss:$8 sps:$4 sm:$0xff]  }
  0xe6   :  { %1712 = vmatpush2.bf16.msra.mxu0 %v5364_v1  ;;  %v5453_v1 = vld [vmem:[#allocation4 + $0x24] ss:$8 sps:$4 sm:$0xff]  }
  0xe7   :  { %1737 = vmatpush1.bf16.msra.mxu1 %v5367_v2  ;;  %1713 = vmatprep.subr.bf16.mxu0 %v5372_v3  ;;  %v5495_v2 = vld [vmem:[#allocation4 + $0x144] ss:$8 sps:$4 sm:$0xff]   ;;  %v5451_v3 = vld [vmem:[#allocation4 + $0x20] ss:$8 sps:$4 sm:$0xff]  }
  0xe8   :  { %1738 = vmatprep.subr.bf16.mxu1 %v5375_v4  ;;  %v5493_v4 = vld [vmem:[#allocation4 + $0x140] ss:$8 sps:$4 sm:$0xff]  }
  0xea   :  { %1714 = vmatpush2.bf16.msra.mxu0 %v5370_v35  ;;  %v5456_v35 = vld [vmem:[#allocation4 + $0x14] ss:$8 sps:$4 sm:$0xff]  }
  0xeb   :  { %1739 = vmatpush1.bf16.msra.mxu1 %v5373_v5  ;;  %1715 = vmatprep.subr.bf16.mxu0 %v5378_v8  ;;  %v5498_v5 = vld [vmem:[#allocation4 + $0x134] ss:$8 sps:$4 sm:$0xff]   ;;  %v5454_v8 = vld [vmem:[#allocation4 + $0x10] ss:$8 sps:$4 sm:$0xff]  }
  0xec   :  { %1740 = vmatprep.subr.bf16.mxu1 %v5381_v9  ;;  %v5496_v9 = vld [vmem:[#allocation4 + $0x130] ss:$8 sps:$4 sm:$0xff]  }
  0xee   :  { %1716 = vmatpush2.bf16.msra.mxu0 %v5376_v10  ;;  %v5459_v10 = vld [vmem:[#allocation4 + $0x4] ss:$8 sps:$4 sm:$0xff]  }
  0xef   :  { %1741 = vmatpush1.bf16.msra.mxu1 %v5379_v11  ;;  %1717 = vmatprep.subr.bf16.mxu0 %v5384_v12  ;;  %v5457_v11 = vld [vmem:[#allocation4] ss:$8 sps:$4 sm:$0xff]   ;;  %v5462_v12 = vld [vmem:[#allocation4 + $0xf4] ss:$8 sps:$4 sm:$0xff]  }
  0xf0   :  { %1742 = vmatprep.subr.bf16.mxu1 %v5387_v13  ;;  %v5460_v13 = vld [vmem:[#allocation4 + $0xf0] ss:$8 sps:$4 sm:$0xff]  }
  0xf2   :  { %1718 = vmatpush2.bf16.msra.mxu0 %v5382_v14  ;;  %v5465_v14 = vld [vmem:[#allocation4 + $0xe4] ss:$8 sps:$4 sm:$0xff]  }
  0xf3   :  { %1743 = vmatpush1.bf16.msra.mxu1 %v5385_v17  ;;  %1769 = vmatprep.subr.bf16.mxu0 %v5393_v19  ;;  %v5501_v17 = vld [vmem:[#allocation4 + $0x124] ss:$8 sps:$4 sm:$0xff]   ;;  %v5499_v19 = vld [vmem:[#allocation4 + $0x120] ss:$8 sps:$4 sm:$0xff]  }
  0xf4   :  { %1744 = vmatprep.subr.bf16.mxu1 %v5390_v18  ;;  %v5463_v18 = vld [vmem:[#allocation4 + $0xe0] ss:$8 sps:$4 sm:$0xff]  }
  0xf5   :  { %1720 = vmatmul.mubr.bf16.vlgmr.msra.gmra.mxu0 %v6099_v7  ;;  %v5417_v7 = vld [vmem:[#allocation2 + $0x66c] ss:$16 sps:$4 sm:$0xff]  }
  0xf6   :  { %1770 = vmatpush1.bf16.msra.mxu0 %v5391_v21  ;;  %1801 = vmatprep.mubr.bf16.mxu0 %v6027_v16 }
  0xf7   :  { %1745 = vmatpush2.bf16.msra.mxu1 %v5388_v20  ;;  %1771 = vmatprep.subr.bf16.mxu0 %v5399_v23 }
  0xf8   :  { %1746 = vmatprep.subr.bf16.mxu1 %v5396_v22  ;;  %v5468_v22 = vld [vmem:[#allocation4 + $0xd4] ss:$8 sps:$4 sm:$0xff]  }
  0xfa   :  { %1772 = vmatpush1.bf16.msra.mxu0 %v5397_v25  ;;  %v5504_v25 = vld [vmem:[#allocation4 + $0x114] ss:$8 sps:$4 sm:$0xff]  }
  0xfb   :  { %1747 = vmatpush2.bf16.msra.mxu1 %v5394_v24  ;;  %1773 = vmatprep.subr.bf16.mxu0 %v5405_v27  ;;  %v5502_v27 = vld [vmem:[#allocation4 + $0x110] ss:$8 sps:$4 sm:$0xff]  }
  0xfc   :  { %1748 = vmatprep.subr.bf16.mxu1 %v5402_v26  ;;  %v5466_v26 = vld [vmem:[#allocation4 + $0xd0] ss:$8 sps:$4 sm:$0xff]  }
  0xfe   :  { %1774 = vmatpush1.bf16.msra.mxu0 %v5403_v29 }
  0xff   :  { %1749 = vmatpush2.bf16.msra.mxu1 %v5400_v28  ;;  %1775 = vmatprep.subr.bf16.mxu0 %v5411_v31 }
 0x100   :  { %1750 = vmatprep.subr.bf16.mxu1 %v5408_v30 }
 0x102   :  { %1776 = vmatpush1.bf16.msra.mxu0 %v5409_v33  ;;  %v5505_v33 = vld [vmem:[#allocation4 + $0x100] ss:$8 sps:$4 sm:$0xff]  }
 0x103   :  { %1751 = vmatpush2.bf16.msra.mxu1 %v5406_v32  ;;  %1777 = vmatprep.subr.bf16.mxu0 %v5417_v7  ;;  %v5471_v32 = vld [vmem:[#allocation4 + $0xc4] ss:$8 sps:$4 sm:$0xff]   ;;  %v5510_v7 = vld [vmem:[#allocation4 + $0x1f4] ss:$8 sps:$4 sm:$0xff]  }
 0x104   :  { %1752 = vmatprep.subr.bf16.mxu1 %v5414_v51  ;;  %v5507_v51 = vld [vmem:[#allocation4 + $0x104] ss:$8 sps:$4 sm:$0xff]  }
 0x106   :  { %1778 = vmatpush1.bf16.msra.mxu0 %v5415_v36  ;;  %v5474_v36 = vld [vmem:[#allocation4 + $0xb4] ss:$8 sps:$4 sm:$0xff]  }
 0x107   :  { %1753 = vmatpush2.bf16.msra.mxu1 %v5412_v34  ;;  %1779 = vmatprep.subr.bf16.mxu0 %v5423_v38  ;;  %v5469_v34 = vld [vmem:[#allocation4 + $0xc0] ss:$8 sps:$4 sm:$0xff]   ;;  %v5513_v38 = vld [vmem:[#allocation4 + $0x1e4] ss:$8 sps:$4 sm:$0xff]  }
 0x108   :  { %1754 = vmatprep.subr.bf16.mxu1 %v5420_v37  ;;  %v5508_v37 = vld [vmem:[#allocation4 + $0x1f0] ss:$8 sps:$4 sm:$0xff]  }
 0x10a   :  { %1780 = vmatpush1.bf16.msra.mxu0 %v5421_v40  ;;  %v5511_v40 = vld [vmem:[#allocation4 + $0x1e0] ss:$8 sps:$4 sm:$0xff]  }
 0x10b   :  { %1755 = vmatpush2.bf16.msra.mxu1 %v5418_v39  ;;  %1781 = vmatprep.subr.bf16.mxu0 %v5429_v42  ;;  %v5472_v39 = vld [vmem:[#allocation4 + $0xb0] ss:$8 sps:$4 sm:$0xff]   ;;  %v5516_v42 = vld [vmem:[#allocation4 + $0x1d4] ss:$8 sps:$4 sm:$0xff]  }
 0x10c   :  { %1756 = vmatprep.subr.bf16.mxu1 %v5426_v41  ;;  %v5477_v41 = vld [vmem:[#allocation4 + $0xa4] ss:$8 sps:$4 sm:$0xff]  }
 0x10e   :  { %1782 = vmatpush1.bf16.msra.mxu0 %v5427_v44  ;;  %v5514_v44 = vld [vmem:[#allocation4 + $0x1d0] ss:$8 sps:$4 sm:$0xff]  }
 0x10f   :  { %1757 = vmatpush2.bf16.msra.mxu1 %v5424_v43  ;;  %1783 = vmatprep.subr.bf16.mxu0 %v5435_v46  ;;  %v5475_v43 = vld [vmem:[#allocation4 + $0xa0] ss:$8 sps:$4 sm:$0xff]   ;;  %v5519_v46 = vld [vmem:[#allocation4 + $0x1c4] ss:$8 sps:$4 sm:$0xff]  }
 0x110   :  { %1758 = vmatprep.subr.bf16.mxu1 %v5432_v45  ;;  %v5480_v45 = vld [vmem:[#allocation4 + $0x94] ss:$8 sps:$4 sm:$0xff]  }
 0x112   :  { %1784 = vmatpush1.bf16.msra.mxu0 %v5433_v49  ;;  %v5517_v49 = vld [vmem:[#allocation4 + $0x1c0] ss:$8 sps:$4 sm:$0xff]  }
 0x113   :  { %1759 = vmatpush2.bf16.msra.mxu1 %v5430_v48  ;;  %2213 = vmatprep.subr.bf16.mxu0 %v5438_v50  ;;  %v5478_v48 = vld [vmem:[#allocation4 + $0x90] ss:$8 sps:$4 sm:$0xff]   ;;  %v5483_v50 = vld [vmem:[#allocation4 + $0x84] ss:$8 sps:$4 sm:$0xff]  }
 0x114   :  { %2254 = vmatprep.subr.bf16.mxu1 %v5486_v60  ;;  %v5526_v60 = vld [vmem:[#allocation4 + $0x190] ss:$8 sps:$4 sm:$0xff]  }
 0x115   :  { %1802 = vmatmul.mubr.bf16.vlgmr.msra.gmra.mxu0 %v5930_v55  ;;  %v5525_v55 = vld [vmem:[#allocation4 + $0x1a4] ss:$8 sps:$4 sm:$0xff]  }
 0x116   :  { %1761 = vmatmul.mubr.bf16.vlgmr.msra.gmra.mxu1 %v6120_v15  ;;  %2214 = vmatpush1.bf16.msra.mxu0 %v5436_v52  ;;  %v5492_v15 = vld [vmem:[#allocation4 + $0x154] ss:$8 sps:$4 sm:$0xff]  }
 0x117   :  { %2215 = vmatprep.subr.bf16.mxu0 %v5441_v53  ;;  %2255 = vmatpush1.bf16.msra.mxu1 %v5484_v59  ;;  %v5522_v52 = vld [vmem:[#allocation4 + $0x1b4] ss:$8 sps:$4 sm:$0xff]   ;;  %v5481_v53 = vld [vmem:[#allocation4 + $0x80] ss:$8 sps:$4 sm:$0xff]  }
 0x118   :  { %2256 = vmatprep.subr.bf16.mxu1 %v5489_v61  ;;  %v5528_v59 = vld [vmem:[#allocation4 + $0x194] ss:$8 sps:$4 sm:$0xff]  }
 0x11a   :  { %2216 = vmatpush1.bf16.msra.mxu0 %v5439_v54  ;;  %v5520_v54 = vld [vmem:[#allocation4 + $0x1b0] ss:$8 sps:$4 sm:$0xff]  }
 0x11b   :  { %2217 = vmatprep.subr.bf16.mxu0 %v5444_v56  ;;  %2257 = vmatpush1.bf16.msra.mxu1 %v5487_v6  ;;  %v5523_v56 = vld [vmem:[#allocation4 + $0x1a0] ss:$8 sps:$4 sm:$0xff]  }
 0x11c   :  { %2258 = vmatprep.subr.bf16.mxu1 %v5492_v15  ;;  %v5529_v6 = vld [vmem:[#allocation4 + $0x180] ss:$8 sps:$4 sm:$0xff]   ;;  %v317_v15 = vlaneseq }
 0x11e   :  { %2218 = vmatpush1.bf16.msra.mxu0 %v5442_v57 }
 0x11f   :  { %2219 = vmatprep.subr.bf16.mxu0 %v5447_v58  ;;  %2259 = vmatpush1.bf16.msra.mxu1 %v5490_v0 }
 0x120   :  { %2260 = vmatprep.subr.bf16.mxu1 %v5495_v2 }
 0x122   :  { %2220 = vmatpush1.bf16.msra.mxu0 %v5445_v62 }
 0x123   :  { %2221 = vmatprep.subr.bf16.mxu0 %v5450_v47  ;;  %2261 = vmatpush1.bf16.msra.mxu1 %v5493_v4  ;;  %v5531_v47 = vld [vmem:[#allocation4 + $0x184] ss:$8 sps:$4 sm:$0xff]  }
 0x124   :  { %2262 = vmatprep.subr.bf16.mxu1 %v5498_v5 }
 0x126   :  { %2222 = vmatpush1.bf16.msra.mxu0 %v5448_v63  ;;  %v6140_v63 = vshrl.u32 %v317_v15, 7  ;;  %v5546_v15 = vld [vmem:[#allocation6 + $0xa4] ss:$16 sps:$4 sm:$0xff]  }
 0x127   :  { %2223 = vmatprep.subr.bf16.mxu0 %v5453_v1  ;;  %2263 = vmatpush1.bf16.msra.mxu1 %v5496_v9  ;;  %v84_v1 = vld [vmem:[%s6246_s6] sm:$0xf] }
 0x128   :  { %2264 = vmatprep.subr.bf16.mxu1 %v5501_v17  ;;  %v6143_v0 = vsub.s32 0, %v6140_v63  ;;  %v6149_v2 = vsub.s32 1, %v6140_v63 }
 0x12a   :  { %2224 = vmatpush1.bf16.msra.mxu0 %v5451_v3  ;;  %v320_v3 = vrot.slane %v84_v1, %v6143_v0  ;;  %v324_v4 = vrot.slane %v84_v1, %v6149_v2 }
 0x12b   :  { %2225 = vmatprep.subr.bf16.mxu0 %v5456_v35  ;;  %2265 = vmatpush1.bf16.msra.mxu1 %v5499_v19 }
 0x12c   :  { %2266 = vmatprep.subr.bf16.mxu1 %v5504_v25 }
 0x12e   :  { %2226 = vmatpush1.bf16.msra.mxu0 %v5454_v8 }
 0x12f   :  { %2227 = vmatprep.subr.bf16.mxu0 %v5459_v10  ;;  %2267 = vmatpush1.bf16.msra.mxu1 %v5502_v27 }
 0x130   :  { %2268 = vmatprep.subr.bf16.mxu1 %v5507_v51  ;;  %v5537_v51 = vld [vmem:[#allocation6 + $0xec] ss:$16 sps:$4 sm:$0xff]  }
 0x132   :  { %2228 = vmatpush1.bf16.msra.mxu0 %v5457_v11 }
 0x133   :  { %2229 = vmatprep.subr.bf16.mxu0 %v5462_v12  ;;  %2269 = vmatpush1.bf16.msra.mxu1 %v5505_v33  ;;  %v5534_v33 = vld [vmem:[#allocation6 + $0xe4] ss:$16 sps:$4 sm:$0xff]  }
 0x134   :  { %2270 = vmatprep.subr.bf16.mxu1 %v5510_v7  ;;  %v6159_v7 = vsub.s32 2, %v6140_v63 }
 0x135   :  { %v6132_v20 = vpop.f32.mrf.mxu0 }
 0x136   :  { %v6134_v21 = vpop.f32.mrf.mxu1  ;;  %2230 = vmatpush2.bf16.msra.mxu0 %v5460_v13  ;;  %v1517_v35 = vadd.f32 %v6132_v20, %v320_v3  ;;  %v5544_v3 = vld [vmem:[#allocation6 + $0xa0] ss:$16 sps:$4 sm:$0xff]  }
 0x137   :  { %v6136_v23 = vpop.f32.mrf.mxu0  ;;  %2231 = vmatprep.subr.bf16.mxu0 %v5465_v14  ;;  %2271 = vmatpush2.bf16.msra.mxu1 %v5508_v37 }
 0x138   :  { %v6138_v24 = vpop.f32.mrf.mxu1  ;;  %2272 = vmatprep.subr.bf16.mxu1 %v5513_v38  ;;  %v1519_v5 = vadd.f32 %v6136_v23, %v324_v4  ;;  %v1558_v8 = vadd.f32 %v6134_v21, %v1517_v35  ;;  %v5547_v4 = vld [vmem:[#allocation6 + $0xa8] ss:$16 sps:$4 sm:$0xff]   ;;  %v5552_v35 = vld [vmem:[#allocation6 + $0x84] ss:$16 sps:$4 sm:$0xff]  }
 0x139   :  { %v1520_v28 = vpop.f32.mrf.mxu0 }
 0x13a   :  { %v1561_v29 = vpop.f32.mrf.mxu1  ;;  %2232 = vmatpush2.bf16.msra.mxu0 %v5463_v18  ;;  %v1560_v10 = vadd.f32 %v6138_v24, %v1519_v5  ;;  %v5555_v5 = vld [vmem:[#allocation6 + $0x8c] ss:$16 sps:$4 sm:$0xff]  }
 0x13b   :  { %v1521_v30 = vpop.f32.mrf.mxu0  ;;  %2233 = vmatprep.subr.bf16.mxu0 %v5468_v22  ;;  %2273 = vmatpush2.bf16.msra.mxu1 %v5511_v40 }
 0x13c   :  { %v1562_v31 = vpop.f32.mrf.mxu1  ;;  %2274 = vmatprep.subr.bf16.mxu1 %v5516_v42 }
 0x13e   :  { %2234 = vmatpush2.bf16.msra.mxu0 %v5466_v26 }
 0x13f   :  { %2235 = vmatprep.subr.bf16.mxu0 %v5471_v32  ;;  %2275 = vmatpush2.bf16.msra.mxu1 %v5514_v44  ;;  %v5532_v32 = vld [vmem:[#allocation6 + $0xe0] ss:$16 sps:$4 sm:$0xff]  }
 0x140   :  { %2276 = vmatprep.subr.bf16.mxu1 %v5519_v46 }
 0x142   :  { %2236 = vmatpush2.bf16.msra.mxu0 %v5469_v34  ;;  %v6162_v34 = vsub.s32 3, %v6140_v63 }
 0x143   :  { %2237 = vmatprep.subr.bf16.mxu0 %v5474_v36  ;;  %2277 = vmatpush2.bf16.msra.mxu1 %v5517_v49  ;;  %v328_v36 = vrot.slane %v84_v1, %v6159_v7 }
 0x144   :  { %2278 = vmatprep.subr.bf16.mxu1 %v5522_v52  ;;  %v332_v37 = vrot.slane %v84_v1, %v6162_v34  ;;  %v5549_v1 = vld [vmem:[#allocation6 + $0xac] ss:$16 sps:$4 sm:$0xff]  }
 0x146   :  { %2238 = vmatpush2.bf16.msra.mxu0 %v5472_v39 }
 0x147   :  { %2239 = vmatprep.subr.bf16.mxu0 %v5477_v41  ;;  %2279 = vmatpush2.bf16.msra.mxu1 %v5520_v54 }
 0x148   :  { %2280 = vmatprep.subr.bf16.mxu1 %v5525_v55 }
 0x14a   :  { %2240 = vmatpush2.bf16.msra.mxu0 %v5475_v43 }
 0x14b   :  { %2241 = vmatprep.subr.bf16.mxu0 %v5480_v45  ;;  %2281 = vmatpush2.bf16.msra.mxu1 %v5523_v56 }
 0x14c   :  { %2282 = vmatprep.subr.bf16.mxu1 %v5528_v59  ;;  %v5535_v59 = vld [vmem:[#allocation6 + $0xe8] ss:$16 sps:$4 sm:$0xff]  }
 0x14e   :  { %2242 = vmatpush2.bf16.msra.mxu0 %v5478_v48 }
 0x14f   :  { %2243 = vmatprep.subr.bf16.mxu0 %v5483_v50  ;;  %2283 = vmatpush2.bf16.msra.mxu1 %v5526_v60 }
 0x150   :  { %2284 = vmatprep.subr.bf16.mxu1 %v5531_v47  ;;  %v5538_v47 = vld [vmem:[#allocation6 + $0xc0] ss:$16 sps:$4 sm:$0xff]  }
 0x152   :  { %2244 = vmatpush2.bf16.msra.mxu0 %v5481_v53 }
 0x153   :  { %2285 = vmatpush2.bf16.msra.mxu1 %v5529_v6  ;;  %2515 = vmatprep.subr.bf16.mxu0 %v5534_v33  ;;  %v5541_v6 = vld [vmem:[#allocation6 + $0xc8] ss:$16 sps:$4 sm:$0xff]   ;;  %v85_v33 = vld [vmem:[%s6246_s6 + $0x4] sm:$0x3] }
 0x154   :  { %2556 = vmatprep.subr.bf16.mxu1 %v5537_v51  ;;  %v1886_v51 = vrot.slane %v85_v33, %v6143_v0 }
 0x156   :  { %v1639_v57 = vpop.f32.mrf.mxu1 }
 0x158   :  { %v1641_v58 = vpop.f32.mrf.mxu1 }
 0x15a   :  { %v1643_v61 = vpop.f32.mrf.mxu1 }
 0x15b   :  { %v5540_v61 = vld [vmem:[#allocation6 + $0xc4] ss:$16 sps:$4 sm:$0xff]  }
 0x15c   :  { %v1644_v62 = vpop.f32.mrf.mxu1 }
 0x15d   :  { %v5543_v62 = vld [vmem:[#allocation6 + $0xcc] ss:$16 sps:$4 sm:$0xff]  }
 0x175   :  { %v1598_v9 = vpop.f32.mrf.mxu0 }
 0x176   :  { %v1599_v11 = vadd.f32 %v1598_v9, %v1558_v8  ;;  %v5550_v8 = vld [vmem:[#allocation6 + $0x80] ss:$16 sps:$4 sm:$0xff]   ;;  %v5558_v9 = vld [vmem:[#allocation6 + $0x64] ss:$16 sps:$4 sm:$0xff]  }
 0x177   :  { %v1600_v12 = vpop.f32.mrf.mxu0 }
 0x178   :  { %v1640_v13 = vadd.f32 %v1639_v57, %v1599_v11  ;;  %v1601_v14 = vadd.f32 %v1600_v12, %v1560_v10  ;;  %v5556_v10 = vld [vmem:[#allocation6 + $0x60] ss:$16 sps:$4 sm:$0xff]   ;;  %v5559_v11 = vld [vmem:[#allocation6 + $0x68] ss:$16 sps:$4 sm:$0xff]   ;;  %v5561_v12 = vld [vmem:[#allocation6 + $0x6c] ss:$16 sps:$4 sm:$0xff]  }
 0x179   :  { %v1602_v17 = vpop.f32.mrf.mxu0 }
 0x17a   :  { %v1642_v18 = vadd.f32 %v1641_v58, %v1601_v14  ;;  %v1810_v19 = vmax.f32 %v1640_v13, 0.0  ;;  %v5564_v13 = vld [vmem:[#allocation6 + $0x44] ss:$16 sps:$4 sm:$0xff]   ;;  %v5567_v14 = vld [vmem:[#allocation6 + $0x4c] ss:$16 sps:$4 sm:$0xff]  }
 0x17b   :  { %v1603_v22 = vpop.f32.mrf.mxu0  ;;  %v5562_v17 = vld [vmem:[#allocation6 + $0x40] ss:$16 sps:$4 sm:$0xff]  }
 0x17c   :  { %v1811_v25 = vmax.f32 %v1642_v18, 0.0  ;;  %v1814_v27 = vpack.c.bf16 %v1810_v19, %v1810_v19  ;;  %v5565_v18 = vld [vmem:[#allocation6 + $0x48] ss:$16 sps:$4 sm:$0xff]   ;;  %v5570_v19 = vld [vmem:[#allocation6 + $0x24] ss:$16 sps:$4 sm:$0xff]  }
 0x17d   :  { %v5573_v22 = vld [vmem:[#allocation6 + $0x2c] ss:$16 sps:$4 sm:$0xff]  }
 0x17e   :  { %v1815_v26 = vpack.c.bf16 %v1811_v25, %v1811_v25  ;;  %v5568_v25 = vld [vmem:[#allocation6 + $0x20] ss:$16 sps:$4 sm:$0xff]  }
 0x180   :  { %2245 = vmatprep.mubr.bf16.mxu0 %v1815_v26  ;;  %v5571_v26 = vld [vmem:[#allocation6 + $0x28] ss:$16 sps:$4 sm:$0xff]  }
 0x181   :  { %2246 = vmatmul.mubr.bf16.vlgmr.msra.gmra.mxu0 %v1814_v27  ;;  %v5576_v27 = vld [vmem:[#allocation6 + $0x4] ss:$16 sps:$4 sm:$0xff]  }
 0x182   :  { %2547 = vmatprep.mubr.bf16.mxu0 %v6027_v16  ;;  %2516 = vmatpush1.bf16.msra.mxu0 %v5532_v32 }
 0x183   :  { %2517 = vmatprep.subr.bf16.mxu0 %v5540_v61  ;;  %v5594_v61 = vld [vmem:[#allocation7 + $0x11c] ss:$28 sps:$4 sm:$0xff]  }
 0x186   :  { %2518 = vmatpush1.bf16.msra.mxu0 %v5538_v47  ;;  %v5592_v47 = vld [vmem:[#allocation7 + $0x118] ss:$28 sps:$4 sm:$0xff]  }
 0x187   :  { %2519 = vmatprep.subr.bf16.mxu0 %v5546_v15  ;;  %v5600_v15 = vld [vmem:[#allocation7 + $0xe4] ss:$28 sps:$4 sm:$0xff]  }
 0x18a   :  { %2520 = vmatpush1.bf16.msra.mxu0 %v5544_v3  ;;  %v5598_v3 = vld [vmem:[#allocation7 + $0xe0] ss:$28 sps:$4 sm:$0xff]  }
 0x18b   :  { %2521 = vmatprep.subr.bf16.mxu0 %v5552_v35  ;;  %v5606_v35 = vld [vmem:[#allocation7 + $0xac] ss:$28 sps:$4 sm:$0xff]  }
 0x18e   :  { %2522 = vmatpush1.bf16.msra.mxu0 %v5550_v8  ;;  %v5604_v8 = vld [vmem:[#allocation7 + $0xa8] ss:$28 sps:$4 sm:$0xff]  }
 0x18f   :  { %2523 = vmatprep.subr.bf16.mxu0 %v5558_v9  ;;  %v5612_v9 = vld [vmem:[#allocation7 + $0x74] ss:$28 sps:$4 sm:$0xff]  }
 0x192   :  { %2524 = vmatpush1.bf16.msra.mxu0 %v5556_v10  ;;  %v5615_v10 = vld [vmem:[#allocation7 + $0x3f4] ss:$28 sps:$4 sm:$0xff]  }
 0x193   :  { %2525 = vmatprep.subr.bf16.mxu0 %v5564_v13  ;;  %v5618_v13 = vld [vmem:[#allocation7 + $0x3c] ss:$28 sps:$4 sm:$0xff]  }
 0x196   :  { %v1680_v20 = vpop.f32.mrf.mxu1  ;;  %2526 = vmatpush1.bf16.msra.mxu0 %v5562_v17  ;;  %v5616_v17 = vld [vmem:[#allocation7 + $0x38] ss:$28 sps:$4 sm:$0xff]  }
 0x197   :  { %v1681_v38 = vadd.f32 %v1680_v20, %v328_v36  ;;  %2527 = vmatprep.subr.bf16.mxu0 %v5570_v19  ;;  %v5579_v20 = vld [vmem:[#allocation6 + $0xc] ss:$16 sps:$4 sm:$0xff]   ;;  %v1890_v36 = vrot.slane %v85_v33, %v6149_v2  ;;  %v5624_v19 = vld [vmem:[#allocation7 + $0x4] ss:$28 sps:$4 sm:$0xff]   ;;  %v5640_v33 = vld [vmem:[#allocation7 + $0x2d8] ss:$28 sps:$4 sm:$0xff]  }
 0x198   :  { %v1682_v21 = vpop.f32.mrf.mxu1 }
 0x199   :  { %v1683_v39 = vadd.f32 %v1682_v21, %v332_v37  ;;  %v5574_v21 = vld [vmem:[#allocation6] ss:$16 sps:$4 sm:$0xff]  }
 0x19a   :  { %v1684_v23 = vpop.f32.mrf.mxu1  ;;  %2528 = vmatpush1.bf16.msra.mxu0 %v5568_v25  ;;  %v5622_v25 = vld [vmem:[#allocation7] ss:$28 sps:$4 sm:$0xff]  }
 0x19b   :  { %v5577_v23 = vld [vmem:[#allocation6 + $0x8] ss:$16 sps:$4 sm:$0xff]   ;;  %2529 = vmatprep.subr.bf16.mxu0 %v5576_v27 }
 0x19c   :  { %v1685_v28 = vpop.f32.mrf.mxu1  ;;  %v5630_v27 = vld [vmem:[#allocation7 + $0x34c] ss:$28 sps:$4 sm:$0xff]  }
 0x19d   :  { %v5582_v28 = vld [vmem:[#allocation7 + $0x18c] ss:$28 sps:$4 sm:$0xff]  }
 0x19e   :  { %2530 = vmatpush1.bf16.msra.mxu0 %v5574_v21  ;;  %v5628_v21 = vld [vmem:[#allocation7 + $0x348] ss:$28 sps:$4 sm:$0xff]  }
 0x19f   :  { %4049 = vmatprep.subr.bf16.mxu0 %v5582_v28  ;;  %v5636_v28 = vld [vmem:[#allocation7 + $0x314] ss:$28 sps:$4 sm:$0xff]  }
 0x1b5   :  { %v1721_v24 = vpop.f32.mrf.mxu0 }
 0x1b6   :  { %v1722_v40 = vadd.f32 %v1721_v24, %v1681_v38  ;;  %v5585_v24 = vld [vmem:[#allocation7 + $0x50c] ss:$28 sps:$4 sm:$0xff]  }
 0x1b7   :  { %v1723_v29 = vpop.f32.mrf.mxu0 }
 0x1b8   :  { %v1724_v43 = vadd.f32 %v1723_v29, %v1683_v39 }
 0x1b9   :  { %v1725_v30 = vpop.f32.mrf.mxu0 }
 0x1bb   :  { %v1726_v31 = vpop.f32.mrf.mxu0 }
 0x1d5   :  { %v1803_v42 = vpop.f32.mrf.mxu0 }
 0x1d6   :  { %v1762_v41 = vpop.f32.mrf.mxu1 }
 0x1d7   :  { %v1763_v44 = vadd.f32 %v1762_v41, %v1722_v40  ;;  %v1805_v46 = vpop.f32.mrf.mxu0 }
 0x1d8   :  { %v1764_v45 = vpop.f32.mrf.mxu1 }
 0x1d9   :  { %v1804_v48 = vadd.f32 %v1803_v42, %v1763_v44  ;;  %v1765_v49 = vadd.f32 %v1764_v45, %v1724_v43  ;;  %v1807_v52 = vpop.f32.mrf.mxu0 }
 0x1da   :  { %v1766_v50 = vpop.f32.mrf.mxu1 }
 0x1db   :  { %v1806_v53 = vadd.f32 %v1805_v46, %v1765_v49  ;;  %v1812_v54 = vmax.f32 %v1804_v48, 0.0  ;;  %v1808_v56 = vpop.f32.mrf.mxu0  ;;  %v2295_v49 = vld [vmem:[%s6241_s1] sm:$0xff] }
 0x1dc   :  { %v1767_v55 = vpop.f32.mrf.mxu1 }
 0x1dd   :  { %v1813_v57 = vmax.f32 %v1806_v53, 0.0  ;;  %v1816_v60 = vpack.c.bf16 %v1812_v54, %v1812_v54  ;;  %v5580_v54 = vld [vmem:[#allocation7 + $0x188] ss:$28 sps:$4 sm:$0xff]  }
 0x1de   :  { %v5583_v55 = vld [vmem:[#allocation7 + $0x508] ss:$28 sps:$4 sm:$0xff]  }
 0x1df   :  { %v1817_v58 = vpack.c.bf16 %v1813_v57, %v1813_v57  ;;  %v5588_v57 = vld [vmem:[#allocation7 + $0x154] ss:$28 sps:$4 sm:$0xff]  }
 0x1e1   :  { %2286 = vmatprep.mubr.bf16.mxu1 %v1817_v58  ;;  %v5591_v58 = vld [vmem:[#allocation7 + $0x4d4] ss:$28 sps:$4 sm:$0xff]  }
 0x1e2   :  { %2287 = vmatmul.mubr.bf16.vlgmr.msra.gmra.mxu1 %v1816_v60  ;;  %v5589_v60 = vld [vmem:[#allocation7 + $0x4d0] ss:$28 sps:$4 sm:$0xff]  }
 0x1e3   :  { %2557 = vmatpush1.bf16.msra.mxu1 %v5535_v59  ;;  %2588 = vmatprep.mubr.bf16.mxu1 %v6027_v16  ;;  %v5553_v16 = vld [vmem:[#allocation6 + $0x88] ss:$16 sps:$4 sm:$0xff]   ;;  %v5586_v59 = vld [vmem:[#allocation7 + $0x150] ss:$28 sps:$4 sm:$0xff]  }
 0x1e4   :  { %2558 = vmatprep.subr.bf16.mxu1 %v5543_v62  ;;  %v5597_v62 = vld [vmem:[#allocation7 + $0x49c] ss:$28 sps:$4 sm:$0xff]  }
 0x1e7   :  { %2559 = vmatpush1.bf16.msra.mxu1 %v5541_v6  ;;  %v5595_v6 = vld [vmem:[#allocation7 + $0x498] ss:$28 sps:$4 sm:$0xff]  }
 0x1e8   :  { %2560 = vmatprep.subr.bf16.mxu1 %v5549_v1  ;;  %v5603_v1 = vld [vmem:[#allocation7 + $0x464] ss:$28 sps:$4 sm:$0xff]  }
 0x1eb   :  { %2561 = vmatpush1.bf16.msra.mxu1 %v5547_v4  ;;  %v5601_v4 = vld [vmem:[#allocation7 + $0x460] ss:$28 sps:$4 sm:$0xff]  }
 0x1ec   :  { %2562 = vmatprep.subr.bf16.mxu1 %v5555_v5  ;;  %v5609_v5 = vld [vmem:[#allocation7 + $0x42c] ss:$28 sps:$4 sm:$0xff]  }
 0x1ef   :  { %2563 = vmatpush1.bf16.msra.mxu1 %v5553_v16  ;;  %v5607_v16 = vld [vmem:[#allocation7 + $0x428] ss:$28 sps:$4 sm:$0xff]  }
 0x1f0   :  { %2564 = vmatprep.subr.bf16.mxu1 %v5561_v12  ;;  %v5613_v12 = vld [vmem:[#allocation7 + $0x3f0] ss:$28 sps:$4 sm:$0xff]  }
 0x1f3   :  { %2565 = vmatpush1.bf16.msra.mxu1 %v5559_v11  ;;  %v5610_v11 = vld [vmem:[#allocation7 + $0x70] ss:$28 sps:$4 sm:$0xff]  }
 0x1f4   :  { %2566 = vmatprep.subr.bf16.mxu1 %v5567_v14  ;;  %v5621_v14 = vld [vmem:[#allocation7 + $0x3bc] ss:$28 sps:$4 sm:$0xff]  }
 0x1f7   :  { %2567 = vmatpush1.bf16.msra.mxu1 %v5565_v18  ;;  %v5619_v18 = vld [vmem:[#allocation7 + $0x3b8] ss:$28 sps:$4 sm:$0xff]  }
 0x1f8   :  { %2568 = vmatprep.subr.bf16.mxu1 %v5573_v22  ;;  %v5627_v22 = vld [vmem:[#allocation7 + $0x384] ss:$28 sps:$4 sm:$0xff]  }
 0x1fb   :  { %2569 = vmatpush1.bf16.msra.mxu1 %v5571_v26  ;;  %v5625_v26 = vld [vmem:[#allocation7 + $0x380] ss:$28 sps:$4 sm:$0xff]  }
 0x1fc   :  { %2570 = vmatprep.subr.bf16.mxu1 %v5579_v20  ;;  %v5633_v20 = vld [vmem:[#allocation7 + $0x6cc] ss:$28 sps:$4 sm:$0xff]  }
 0x1ff   :  { %2571 = vmatpush1.bf16.msra.mxu1 %v5577_v23  ;;  %v5631_v23 = vld [vmem:[#allocation7 + $0x6c8] ss:$28 sps:$4 sm:$0xff]  }
 0x200   :  { %4090 = vmatprep.subr.bf16.mxu1 %v5585_v24  ;;  %v5639_v24 = vld [vmem:[#allocation7 + $0x694] ss:$28 sps:$4 sm:$0xff]  }
 0x241   :  { %v2247_v29 = vpop.f32.mrf.mxu0 }
 0x242   :  { %v2248_v38 = vadd.f32 %v2247_v29, %v1886_v51  ;;  %v5634_v29 = vld [vmem:[#allocation7 + $0x310] ss:$28 sps:$4 sm:$0xff]   ;;  %v5643_v51 = vld [vmem:[#allocation7 + $0x658] ss:$28 sps:$4 sm:$0xff]  }
 0x243   :  { %v2249_v30 = vpop.f32.mrf.mxu0 }
 0x244   :  { %v2250_v39 = vadd.f32 %v2249_v30, %v1890_v36  ;;  %v5637_v30 = vld [vmem:[#allocation7 + $0x690] ss:$28 sps:$4 sm:$0xff]   ;;  %v5648_v36 = vld [vmem:[#allocation7 + $0x2a4] ss:$28 sps:$4 sm:$0xff]  }
 0x245   :  { %v2251_v31 = vpop.f32.mrf.mxu0 }
 0x246   :  { %v5642_v31 = vld [vmem:[#allocation7 + $0x2dc] ss:$28 sps:$4 sm:$0xff]  }
 0x247   :  { %v2252_v32 = vpop.f32.mrf.mxu0 }
 0x248   :  { %v5645_v32 = vld [vmem:[#allocation7 + $0x65c] ss:$28 sps:$4 sm:$0xff]  }
 0x2a2   :  { %v2288_v37 = vpop.f32.mrf.mxu1 }
 0x2a3   :  { %v2289_v41 = vadd.f32 %v2288_v37, %v2248_v38  ;;  %v5651_v37 = vld [vmem:[#allocation7 + $0x624] ss:$28 sps:$4 sm:$0xff]  }
 0x2a4   :  { %v2290_v40 = vpop.f32.mrf.mxu1  ;;  %v5646_v38 = vld [vmem:[#allocation7 + $0x2a0] ss:$28 sps:$4 sm:$0xff]  }
 0x2a5   :  { %v2291_v42 = vadd.f32 %v2290_v40, %v2250_v39  ;;  %v5649_v39 = vld [vmem:[#allocation7 + $0x620] ss:$28 sps:$4 sm:$0xff]   ;;  %v5654_v40 = vld [vmem:[#allocation7 + $0x26c] ss:$28 sps:$4 sm:$0xff]  }
 0x2a6   :  { %v2292_v43 = vpop.f32.mrf.mxu1 }
 0x2a7   :  { %v2296_v44 = vmul.f32 0.5, %v2291_v42  ;;  %v5037_v45 = vpack.c.bf16 %v2291_v42, %v2289_v41  ;;  %v5652_v42 = vld [vmem:[#allocation7 + $0x268] ss:$28 sps:$4 sm:$0xff]  }
 0x2a8   :  { %v2293_v46 = vpop.f32.mrf.mxu1  ;;  %v5655_v43 = vld [vmem:[#allocation7 + $0x5e8] ss:$28 sps:$4 sm:$0xff]  }
 0x2a9   :  { %v2297_v48 = vmul.f32 1.442695, %v2296_v44  ;;  %4458 = vst [vmem:[%s6248_s8] sm:$0xff] %v5037_v45  ;;  %v5660_v44 = vld [vmem:[#allocation7 + $0x234] ss:$28 sps:$4 sm:$0xff]  }
 0x2aa   :  { %v5663_v45 = vld [vmem:[#allocation7 + $0x5b4] ss:$28 sps:$4 sm:$0xff]  }
 0x2ab   :  { %5900 = vpow2.f32 %v2297_v48  ;;  %v5658_v46 = vld [vmem:[#allocation7 + $0x230] ss:$28 sps:$4 sm:$0xff]  }
 0x2ac   :  { %v5661_v48 = vld [vmem:[#allocation7 + $0x5b0] ss:$28 sps:$4 sm:$0xff]  }
 0x2b8   :  { %v5901_v50 = vpop.eup %5900 }
 0x2b9   :  { %v2299_v52 = vmul.f32 %v5901_v50, %v2295_v49  ;;  %v5666_v49 = vld [vmem:[#allocation7 + $0x1fc] ss:$28 sps:$4 sm:$0xff]  }
 0x2ba   :  { %v5669_v50 = vld [vmem:[#allocation7 + $0x57c] ss:$28 sps:$4 sm:$0xff]  }
 0x2bb   :  { %v2300_v53 = vadd.f32 %v2299_v52, %v2289_v41  ;;  %v5657_v41 = vld [vmem:[#allocation7 + $0x5ec] ss:$28 sps:$4 sm:$0xff]   ;;  %v5664_v52 = vld [vmem:[#allocation7 + $0x1f8] ss:$28 sps:$4 sm:$0xff]  }
 0x2bd   :  { %v2301_v56 = vpack.c.bf16 %v2300_v53, %v2300_v53  ;;  %v5667_v53 = vld [vmem:[#allocation7 + $0x578] ss:$28 sps:$4 sm:$0xff]  }
 0x2bf   :  { %2548 = vmatmul.mubr.bf16.vlgmr.msra.gmra.mxu0 %v2301_v56  ;;  %2589 = vmatmul.mubr.bf16.vlgmr.msra.gmra.mxu1 %v2301_v56  ;;  %v5670_v56 = vld [vmem:[#allocation7 + $0x1c0] ss:$28 sps:$4 sm:$0xff]  }
 0x2c0   :  { %4050 = vmatpush1.bf16.msra.mxu0 %v5580_v54  ;;  %4091 = vmatpush1.bf16.msra.mxu1 %v5583_v55  ;;  %v5672_v54 = vld [vmem:[#allocation7 + $0x1c4] ss:$28 sps:$4 sm:$0xff]  }
 0x2c1   :  { %4051 = vmatprep.subr.bf16.mxu0 %v5588_v57  ;;  %4092 = vmatprep.subr.bf16.mxu1 %v5591_v58  ;;  %v5675_v55 = vld [vmem:[#allocation7 + $0x544] ss:$28 sps:$4 sm:$0xff]   ;;  %v5678_v58 = vld [vmem:[#allocation7 + $0x194] ss:$28 sps:$4 sm:$0xff]  }
 0x2c2   :  { %v5673_v57 = vld [vmem:[#allocation7 + $0x540] ss:$28 sps:$4 sm:$0xff]  }
 0x2c4   :  { %4052 = vmatpush1.bf16.msra.mxu0 %v5586_v59  ;;  %4093 = vmatpush1.bf16.msra.mxu1 %v5589_v60  ;;  %v5681_v59 = vld [vmem:[#allocation7 + $0x514] ss:$28 sps:$4 sm:$0xff]   ;;  %v86_v60 = vld [vmem:[%s6246_s6 + $0x6] sm:$0xf] }
 0x2c5   :  { %4053 = vmatprep.subr.bf16.mxu0 %v5594_v61  ;;  %4094 = vmatprep.subr.bf16.mxu1 %v5597_v62  ;;  %v2338_v61 = vrot.slane %v86_v60, %v6143_v0  ;;  %v2346_v62 = vrot.slane %v86_v60, %v6159_v7 }
 0x2c8   :  { %4054 = vmatpush1.bf16.msra.mxu0 %v5592_v47  ;;  %4095 = vmatpush1.bf16.msra.mxu1 %v5595_v6  ;;  %v2342_v47 = vrot.slane %v86_v60, %v6149_v2  ;;  %v2350_v6 = vrot.slane %v86_v60, %v6162_v34  ;;  %v5732_v60 = vld [vmem:[#allocation7 + $0x31c] ss:$28 sps:$4 sm:$0xff]  }
 0x2c9   :  { %4055 = vmatprep.subr.bf16.mxu0 %v5600_v15  ;;  %4096 = vmatprep.subr.bf16.mxu1 %v5603_v1 }
 0x2cc   :  { %4056 = vmatpush1.bf16.msra.mxu0 %v5598_v3  ;;  %4097 = vmatpush1.bf16.msra.mxu1 %v5601_v4 }
 0x2cd   :  { %4057 = vmatprep.subr.bf16.mxu0 %v5606_v35  ;;  %4098 = vmatprep.subr.bf16.mxu1 %v5609_v5 }
 0x2d0   :  { %4058 = vmatpush1.bf16.msra.mxu0 %v5604_v8  ;;  %4099 = vmatpush1.bf16.msra.mxu1 %v5607_v16 }
 0x2d1   :  { %4059 = vmatprep.subr.bf16.mxu0 %v5612_v9  ;;  %4100 = vmatprep.subr.bf16.mxu1 %v5615_v10 }
 0x2d4   :  { %4060 = vmatpush1.bf16.msra.mxu0 %v5610_v11  ;;  %4101 = vmatpush1.bf16.msra.mxu1 %v5613_v12 }
 0x2d5   :  { %4061 = vmatprep.subr.bf16.mxu0 %v5618_v13  ;;  %4102 = vmatprep.subr.bf16.mxu1 %v5621_v14 }
 0x2d8   :  { %4062 = vmatpush1.bf16.msra.mxu0 %v5616_v17  ;;  %4103 = vmatpush1.bf16.msra.mxu1 %v5619_v18 }
 0x2d9   :  { %4063 = vmatprep.subr.bf16.mxu0 %v5624_v19  ;;  %4104 = vmatprep.subr.bf16.mxu1 %v5627_v22 }
 0x2dc   :  { %4064 = vmatpush1.bf16.msra.mxu0 %v5622_v25  ;;  %4105 = vmatpush1.bf16.msra.mxu1 %v5625_v26  ;;  %v5676_v25 = vld [vmem:[#allocation7 + $0x190] ss:$28 sps:$4 sm:$0xff]  }
 0x2dd   :  { %4065 = vmatprep.subr.bf16.mxu0 %v5630_v27  ;;  %4106 = vmatprep.subr.bf16.mxu1 %v5633_v20  ;;  %v5679_v26 = vld [vmem:[#allocation7 + $0x510] ss:$28 sps:$4 sm:$0xff]  }
 0x2e0   :  { %4066 = vmatpush2.bf16.msra.mxu0 %v5628_v21  ;;  %4107 = vmatpush2.bf16.msra.mxu1 %v5631_v23  ;;  %v5684_v21 = vld [vmem:[#allocation7 + $0x15c] ss:$28 sps:$4 sm:$0xff]  }
 0x2e1   :  { %4067 = vmatprep.subr.bf16.mxu0 %v5636_v28  ;;  %4108 = vmatprep.subr.bf16.mxu1 %v5639_v24  ;;  %v5687_v23 = vld [vmem:[#allocation7 + $0x4dc] ss:$28 sps:$4 sm:$0xff]  }
 0x2e2   :  { %v5682_v28 = vld [vmem:[#allocation7 + $0x158] ss:$28 sps:$4 sm:$0xff]  }
 0x2e3   :  { %v5685_v24 = vld [vmem:[#allocation7 + $0x4d8] ss:$28 sps:$4 sm:$0xff]  }
 0x2e4   :  { %4068 = vmatpush2.bf16.msra.mxu0 %v5634_v29  ;;  %4109 = vmatpush2.bf16.msra.mxu1 %v5637_v30  ;;  %v5690_v29 = vld [vmem:[#allocation7 + $0x124] ss:$28 sps:$4 sm:$0xff]  }
 0x2e5   :  { %4069 = vmatprep.subr.bf16.mxu0 %v5642_v31  ;;  %4110 = vmatprep.subr.bf16.mxu1 %v5645_v32  ;;  %v5693_v30 = vld [vmem:[#allocation7 + $0x4a4] ss:$28 sps:$4 sm:$0xff]  }
 0x2e6   :  { %v5688_v31 = vld [vmem:[#allocation7 + $0x120] ss:$28 sps:$4 sm:$0xff]  }
 0x2e7   :  { %v5691_v32 = vld [vmem:[#allocation7 + $0x4a0] ss:$28 sps:$4 sm:$0xff]  }
 0x2e8   :  { %4070 = vmatpush2.bf16.msra.mxu0 %v5640_v33  ;;  %4111 = vmatpush2.bf16.msra.mxu1 %v5643_v51  ;;  %v5696_v33 = vld [vmem:[#allocation7 + $0xec] ss:$28 sps:$4 sm:$0xff]  }
 0x2e9   :  { %4071 = vmatprep.subr.bf16.mxu0 %v5648_v36  ;;  %4112 = vmatprep.subr.bf16.mxu1 %v5651_v37  ;;  %v5699_v51 = vld [vmem:[#allocation7 + $0x46c] ss:$28 sps:$4 sm:$0xff]  }
 0x2ea   :  { %v5694_v36 = vld [vmem:[#allocation7 + $0xe8] ss:$28 sps:$4 sm:$0xff]  }
 0x2eb   :  { %v5697_v37 = vld [vmem:[#allocation7 + $0x468] ss:$28 sps:$4 sm:$0xff]  }
 0x2ec   :  { %4072 = vmatpush2.bf16.msra.mxu0 %v5646_v38  ;;  %4113 = vmatpush2.bf16.msra.mxu1 %v5649_v39  ;;  %v5702_v38 = vld [vmem:[#allocation7 + $0xb4] ss:$28 sps:$4 sm:$0xff]  }
 0x2ed   :  { %4073 = vmatprep.subr.bf16.mxu0 %v5654_v40  ;;  %4114 = vmatprep.subr.bf16.mxu1 %v5657_v41  ;;  %v5705_v39 = vld [vmem:[#allocation7 + $0x434] ss:$28 sps:$4 sm:$0xff]  }
 0x2ee   :  { %v5700_v40 = vld [vmem:[#allocation7 + $0xb0] ss:$28 sps:$4 sm:$0xff]  }
 0x2ef   :  { %v5703_v41 = vld [vmem:[#allocation7 + $0x430] ss:$28 sps:$4 sm:$0xff]  }
 0x2f0   :  { %4074 = vmatpush2.bf16.msra.mxu0 %v5652_v42  ;;  %4115 = vmatpush2.bf16.msra.mxu1 %v5655_v43  ;;  %v5708_v42 = vld [vmem:[#allocation7 + $0x7c] ss:$28 sps:$4 sm:$0xff]  }
 0x2f1   :  { %4075 = vmatprep.subr.bf16.mxu0 %v5660_v44  ;;  %4116 = vmatprep.subr.bf16.mxu1 %v5663_v45  ;;  %v5711_v43 = vld [vmem:[#allocation7 + $0x3fc] ss:$28 sps:$4 sm:$0xff]  }
 0x2f2   :  { %v5706_v44 = vld [vmem:[#allocation7 + $0x78] ss:$28 sps:$4 sm:$0xff]  }
 0x2f3   :  { %v5709_v45 = vld [vmem:[#allocation7 + $0x3f8] ss:$28 sps:$4 sm:$0xff]  }
 0x2f4   :  { %4076 = vmatpush2.bf16.msra.mxu0 %v5658_v46  ;;  %4117 = vmatpush2.bf16.msra.mxu1 %v5661_v48  ;;  %v5714_v46 = vld [vmem:[#allocation7 + $0x44] ss:$28 sps:$4 sm:$0xff]  }
 0x2f5   :  { %4077 = vmatprep.subr.bf16.mxu0 %v5666_v49  ;;  %4118 = vmatprep.subr.bf16.mxu1 %v5669_v50  ;;  %v5717_v48 = vld [vmem:[#allocation7 + $0x3c4] ss:$28 sps:$4 sm:$0xff]  }
 0x2f6   :  { %v5712_v49 = vld [vmem:[#allocation7 + $0x40] ss:$28 sps:$4 sm:$0xff]  }
 0x2f7   :  { %v5715_v50 = vld [vmem:[#allocation7 + $0x3c0] ss:$28 sps:$4 sm:$0xff]  }
 0x2f8   :  { %4078 = vmatpush2.bf16.msra.mxu0 %v5664_v52  ;;  %4119 = vmatpush2.bf16.msra.mxu1 %v5667_v53  ;;  %v5720_v52 = vld [vmem:[#allocation7 + $0xc] ss:$28 sps:$4 sm:$0xff]  }
 0x2f9   :  { %4079 = vmatprep.subr.bf16.mxu0 %v5672_v54  ;;  %4120 = vmatprep.subr.bf16.mxu1 %v5675_v55  ;;  %v5723_v53 = vld [vmem:[#allocation7 + $0x38c] ss:$28 sps:$4 sm:$0xff]  }
 0x2fa   :  { %v5718_v54 = vld [vmem:[#allocation7 + $0x8] ss:$28 sps:$4 sm:$0xff]  }
 0x2fb   :  { %v5721_v55 = vld [vmem:[#allocation7 + $0x388] ss:$28 sps:$4 sm:$0xff]  }
 0x2fc   :  { %4080 = vmatpush2.bf16.msra.mxu0 %v5670_v56  ;;  %4121 = vmatpush2.bf16.msra.mxu1 %v5673_v57  ;;  %v5726_v56 = vld [vmem:[#allocation7 + $0x354] ss:$28 sps:$4 sm:$0xff]  }
 0x2fd   :  { %4131 = vmatprep.subr.bf16.mxu0 %v5678_v58  ;;  %4172 = vmatprep.subr.bf16.mxu1 %v5681_v59  ;;  %v5729_v57 = vld [vmem:[#allocation7 + $0x6d4] ss:$28 sps:$4 sm:$0xff]  }
 0x2fe   :  { %v5724_v58 = vld [vmem:[#allocation7 + $0x350] ss:$28 sps:$4 sm:$0xff]  }
 0x2ff   :  { %v5727_v59 = vld [vmem:[#allocation7 + $0x6d0] ss:$28 sps:$4 sm:$0xff]  }
 0x37f   :  { %v2549_v15 = vpop.f32.mrf.mxu0  ;;  %v2590_v1 = vpop.f32.mrf.mxu1 }
 0x380   :  { %v2550_v3 = vadd.f32 %v2549_v15, %v2338_v61  ;;  %v2591_v4 = vadd.f32 %v2590_v1, %v2346_v62  ;;  %v5735_v61 = vld [vmem:[#allocation7 + $0x69c] ss:$28 sps:$4 sm:$0xff]   ;;  %v5741_v15 = vld [vmem:[#allocation7 + $0x664] ss:$28 sps:$4 sm:$0xff]  }
 0x381   :  { %v2551_v35 = vpop.f32.mrf.mxu0  ;;  %v2592_v5 = vpop.f32.mrf.mxu1  ;;  %v5730_v62 = vld [vmem:[#allocation7 + $0x318] ss:$28 sps:$4 sm:$0xff]   ;;  %v5736_v1 = vld [vmem:[#allocation7 + $0x2e0] ss:$28 sps:$4 sm:$0xff]  }
 0x382   :  { %v2552_v8 = vadd.f32 %v2551_v35, %v2342_v47  ;;  %v2593_v16 = vadd.f32 %v2592_v5, %v2350_v6  ;;  %v2597_v9 = vmax.f32 %v2550_v3, 0.0  ;;  %v2599_v10 = vmax.f32 %v2591_v4, 0.0  ;;  %v5733_v47 = vld [vmem:[#allocation7 + $0x698] ss:$28 sps:$4 sm:$0xff]   ;;  %v5738_v6 = vld [vmem:[#allocation7 + $0x2e4] ss:$28 sps:$4 sm:$0xff]  }
 0x383   :  { %v2553_v11 = vpop.f32.mrf.mxu0  ;;  %v2594_v12 = vpop.f32.mrf.mxu1  ;;  %v5739_v3 = vld [vmem:[#allocation7 + $0x660] ss:$28 sps:$4 sm:$0xff]   ;;  %v5744_v4 = vld [vmem:[#allocation7 + $0x2ac] ss:$28 sps:$4 sm:$0xff]  }
 0x384   :  { %v2598_v13 = vmax.f32 %v2552_v8, 0.0  ;;  %v2600_v14 = vmax.f32 %v2593_v16, 0.0  ;;  %v6189_v27 = vpack.c.bf16 %v2597_v9, %v2597_v9  ;;  %v6191_v20 = vpack.c.bf16 %v2599_v10, %v2599_v10  ;;  %v5747_v35 = vld [vmem:[#allocation7 + $0x62c] ss:$28 sps:$4 sm:$0xff]   ;;  %v5750_v16 = vld [vmem:[#allocation7 + $0x274] ss:$28 sps:$4 sm:$0xff]  }
 0x385   :  { %v2554_v17 = vpop.f32.mrf.mxu0  ;;  %v2595_v18 = vpop.f32.mrf.mxu1  ;;  %v5742_v5 = vld [vmem:[#allocation7 + $0x2a8] ss:$28 sps:$4 sm:$0xff]   ;;  %v5753_v9 = vld [vmem:[#allocation7 + $0x5f4] ss:$28 sps:$4 sm:$0xff]   ;;  %v5756_v12 = vld [vmem:[#allocation7 + $0x23c] ss:$28 sps:$4 sm:$0xff]  }
 0x386   :  { %v6185_v19 = vpack.c.bf16 %v2598_v13, %v2598_v13  ;;  %v6187_v22 = vpack.c.bf16 %v2600_v14, %v2600_v14  ;;  %v5745_v8 = vld [vmem:[#allocation7 + $0x628] ss:$28 sps:$4 sm:$0xff]   ;;  %v5748_v10 = vld [vmem:[#allocation7 + $0x270] ss:$28 sps:$4 sm:$0xff]   ;;  %v5759_v13 = vld [vmem:[#allocation7 + $0x5bc] ss:$28 sps:$4 sm:$0xff]  }
 0x387   :  { %v5751_v11 = vld [vmem:[#allocation7 + $0x5f0] ss:$28 sps:$4 sm:$0xff]   ;;  %v5754_v14 = vld [vmem:[#allocation7 + $0x238] ss:$28 sps:$4 sm:$0xff]   ;;  %v5762_v18 = vld [vmem:[#allocation7 + $0x204] ss:$28 sps:$4 sm:$0xff]  }
 0x388   :  { %4081 = vmatprep.mubr.bf16.mxu0 %v6185_v19  ;;  %4122 = vmatprep.mubr.bf16.mxu1 %v6187_v22  ;;  %v5757_v17 = vld [vmem:[#allocation7 + $0x5b8] ss:$28 sps:$4 sm:$0xff]  }
 0x389   :  { %4082 = vmatmul.mubr.bf16.vlgmr.msra.gmra.mxu0 %v6189_v27  ;;  %4123 = vmatmul.mubr.bf16.vlgmr.msra.gmra.mxu1 %v6191_v20 }
 0x38a   :  { %4132 = vmatpush1.bf16.msra.mxu0 %v5676_v25  ;;  %4173 = vmatpush1.bf16.msra.mxu1 %v5679_v26  ;;  %v5765_v25 = vld [vmem:[#allocation7 + $0x584] ss:$28 sps:$4 sm:$0xff]  }
 0x38b   :  { %4163 = vmatprep.mubr.bf16.mxu0 %v6185_v19  ;;  %4204 = vmatprep.mubr.bf16.mxu1 %v6187_v22  ;;  %v5760_v26 = vld [vmem:[#allocation7 + $0x200] ss:$28 sps:$4 sm:$0xff]  }
 0x38c   :  { %4133 = vmatprep.subr.bf16.mxu0 %v5684_v21  ;;  %4174 = vmatprep.subr.bf16.mxu1 %v5687_v23  ;;  %v5763_v21 = vld [vmem:[#allocation7 + $0x580] ss:$28 sps:$4 sm:$0xff]   ;;  %v5768_v23 = vld [vmem:[#allocation7 + $0x1cc] ss:$28 sps:$4 sm:$0xff]  }
 0x38e   :  { %4134 = vmatpush1.bf16.msra.mxu0 %v5682_v28  ;;  %4175 = vmatpush1.bf16.msra.mxu1 %v5685_v24  ;;  %v5771_v28 = vld [vmem:[#allocation7 + $0x54c] ss:$28 sps:$4 sm:$0xff]  }
 0x38f   :  { %4135 = vmatprep.subr.bf16.mxu0 %v5690_v29  ;;  %4176 = vmatprep.subr.bf16.mxu1 %v5693_v30  ;;  %v5766_v24 = vld [vmem:[#allocation7 + $0x1c8] ss:$28 sps:$4 sm:$0xff]   ;;  %v5774_v30 = vld [vmem:[#allocation7 + $0x19c] ss:$28 sps:$4 sm:$0xff]  }
 0x390   :  { %v5769_v29 = vld [vmem:[#allocation7 + $0x548] ss:$28 sps:$4 sm:$0xff]  }
 0x392   :  { %4136 = vmatpush1.bf16.msra.mxu0 %v5688_v31  ;;  %4177 = vmatpush1.bf16.msra.mxu1 %v5691_v32  ;;  %v5777_v31 = vld [vmem:[#allocation7 + $0x51c] ss:$28 sps:$4 sm:$0xff]  }
 0x393   :  { %4137 = vmatprep.subr.bf16.mxu0 %v5696_v33  ;;  %4178 = vmatprep.subr.bf16.mxu1 %v5699_v51  ;;  %v5772_v32 = vld [vmem:[#allocation7 + $0x198] ss:$28 sps:$4 sm:$0xff]   ;;  %v5780_v51 = vld [vmem:[#allocation7 + $0x164] ss:$28 sps:$4 sm:$0xff]  }
 0x394   :  { %v5775_v33 = vld [vmem:[#allocation7 + $0x518] ss:$28 sps:$4 sm:$0xff]  }
 0x396   :  { %4138 = vmatpush1.bf16.msra.mxu0 %v5694_v36  ;;  %4179 = vmatpush1.bf16.msra.mxu1 %v5697_v37  ;;  %v5783_v36 = vld [vmem:[#allocation7 + $0x4e4] ss:$28 sps:$4 sm:$0xff]  }
 0x397   :  { %4139 = vmatprep.subr.bf16.mxu0 %v5702_v38  ;;  %4180 = vmatprep.subr.bf16.mxu1 %v5705_v39  ;;  %v5778_v37 = vld [vmem:[#allocation7 + $0x160] ss:$28 sps:$4 sm:$0xff]   ;;  %v5786_v39 = vld [vmem:[#allocation7 + $0x12c] ss:$28 sps:$4 sm:$0xff]  }
 0x398   :  { %v5781_v38 = vld [vmem:[#allocation7 + $0x4e0] ss:$28 sps:$4 sm:$0xff]  }
 0x39a   :  { %4140 = vmatpush1.bf16.msra.mxu0 %v5700_v40  ;;  %4181 = vmatpush1.bf16.msra.mxu1 %v5703_v41  ;;  %v5789_v40 = vld [vmem:[#allocation7 + $0x4ac] ss:$28 sps:$4 sm:$0xff]  }
 0x39b   :  { %4141 = vmatprep.subr.bf16.mxu0 %v5708_v42  ;;  %4182 = vmatprep.subr.bf16.mxu1 %v5711_v43  ;;  %v5784_v41 = vld [vmem:[#allocation7 + $0x128] ss:$28 sps:$4 sm:$0xff]   ;;  %v5792_v43 = vld [vmem:[#allocation7 + $0xf4] ss:$28 sps:$4 sm:$0xff]  }
 0x39c   :  { %v5787_v42 = vld [vmem:[#allocation7 + $0x4a8] ss:$28 sps:$4 sm:$0xff]  }
 0x39e   :  { %4142 = vmatpush1.bf16.msra.mxu0 %v5706_v44  ;;  %4183 = vmatpush1.bf16.msra.mxu1 %v5709_v45  ;;  %v5795_v44 = vld [vmem:[#allocation7 + $0x474] ss:$28 sps:$4 sm:$0xff]  }
 0x39f   :  { %4143 = vmatprep.subr.bf16.mxu0 %v5714_v46  ;;  %4184 = vmatprep.subr.bf16.mxu1 %v5717_v48  ;;  %v5790_v45 = vld [vmem:[#allocation7 + $0xf0] ss:$28 sps:$4 sm:$0xff]   ;;  %v5798_v48 = vld [vmem:[#allocation7 + $0xbc] ss:$28 sps:$4 sm:$0xff]  }
 0x3a0   :  { %v5793_v46 = vld [vmem:[#allocation7 + $0x470] ss:$28 sps:$4 sm:$0xff]  }
 0x3a2   :  { %4144 = vmatpush1.bf16.msra.mxu0 %v5712_v49  ;;  %4185 = vmatpush1.bf16.msra.mxu1 %v5715_v50  ;;  %v5801_v49 = vld [vmem:[#allocation7 + $0x43c] ss:$28 sps:$4 sm:$0xff]  }
 0x3a3   :  { %4145 = vmatprep.subr.bf16.mxu0 %v5720_v52  ;;  %4186 = vmatprep.subr.bf16.mxu1 %v5723_v53  ;;  %v5796_v50 = vld [vmem:[#allocation7 + $0xb8] ss:$28 sps:$4 sm:$0xff]   ;;  %v5804_v53 = vld [vmem:[#allocation7 + $0x84] ss:$28 sps:$4 sm:$0xff]  }
 0x3a4   :  { %v5799_v52 = vld [vmem:[#allocation7 + $0x438] ss:$28 sps:$4 sm:$0xff]  }
 0x3a6   :  { %4146 = vmatpush1.bf16.msra.mxu0 %v5718_v54  ;;  %4187 = vmatpush1.bf16.msra.mxu1 %v5721_v55  ;;  %v5807_v54 = vld [vmem:[#allocation7 + $0x404] ss:$28 sps:$4 sm:$0xff]  }
 0x3a7   :  { %4147 = vmatprep.subr.bf16.mxu0 %v5726_v56  ;;  %4188 = vmatprep.subr.bf16.mxu1 %v5729_v57  ;;  %v5802_v55 = vld [vmem:[#allocation7 + $0x80] ss:$28 sps:$4 sm:$0xff]   ;;  %v5810_v57 = vld [vmem:[#allocation7 + $0x4c] ss:$28 sps:$4 sm:$0xff]  }
 0x3a8   :  { %v5805_v56 = vld [vmem:[#allocation7 + $0x400] ss:$28 sps:$4 sm:$0xff]  }
 0x3aa   :  { %4148 = vmatpush2.bf16.msra.mxu0 %v5724_v58  ;;  %4189 = vmatpush2.bf16.msra.mxu1 %v5727_v59  ;;  %v5813_v58 = vld [vmem:[#allocation7 + $0x3cc] ss:$28 sps:$4 sm:$0xff]  }
 0x3ab   :  { %4149 = vmatprep.subr.bf16.mxu0 %v5732_v60  ;;  %4190 = vmatprep.subr.bf16.mxu1 %v5735_v61  ;;  %v5808_v59 = vld [vmem:[#allocation7 + $0x48] ss:$28 sps:$4 sm:$0xff]   ;;  %v5816_v61 = vld [vmem:[#allocation7 + $0x14] ss:$28 sps:$4 sm:$0xff]  }
 0x3ac   :  { %v5811_v60 = vld [vmem:[#allocation7 + $0x3c8] ss:$28 sps:$4 sm:$0xff]  }
 0x3ae   :  { %4150 = vmatpush2.bf16.msra.mxu0 %v5730_v62  ;;  %4191 = vmatpush2.bf16.msra.mxu1 %v5733_v47  ;;  %v5819_v62 = vld [vmem:[#allocation7 + $0x394] ss:$28 sps:$4 sm:$0xff]  }
 0x3af   :  { %4151 = vmatprep.subr.bf16.mxu0 %v5738_v6  ;;  %4192 = vmatprep.subr.bf16.mxu1 %v5741_v15  ;;  %v5814_v47 = vld [vmem:[#allocation7 + $0x10] ss:$28 sps:$4 sm:$0xff]   ;;  %v5822_v15 = vld [vmem:[#allocation7 + $0x35c] ss:$28 sps:$4 sm:$0xff]  }
 0x3b0   :  { %v5817_v6 = vld [vmem:[#allocation7 + $0x390] ss:$28 sps:$4 sm:$0xff]  }
 0x3b2   :  { %4152 = vmatpush2.bf16.msra.mxu0 %v5736_v1  ;;  %4193 = vmatpush2.bf16.msra.mxu1 %v5739_v3  ;;  %v5825_v1 = vld [vmem:[#allocation7 + $0x6dc] ss:$28 sps:$4 sm:$0xff]  }
 0x3b3   :  { %4153 = vmatprep.subr.bf16.mxu0 %v5744_v4  ;;  %4194 = vmatprep.subr.bf16.mxu1 %v5747_v35  ;;  %v5820_v3 = vld [vmem:[#allocation7 + $0x358] ss:$28 sps:$4 sm:$0xff]   ;;  %v5828_v35 = vld [vmem:[#allocation7 + $0x324] ss:$28 sps:$4 sm:$0xff]  }
 0x3b4   :  { %v5823_v4 = vld [vmem:[#allocation7 + $0x6d8] ss:$28 sps:$4 sm:$0xff]  }
 0x3b6   :  { %4154 = vmatpush2.bf16.msra.mxu0 %v5742_v5  ;;  %4195 = vmatpush2.bf16.msra.mxu1 %v5745_v8  ;;  %v5831_v5 = vld [vmem:[#allocation7 + $0x6a4] ss:$28 sps:$4 sm:$0xff]  }
 0x3b7   :  { %4155 = vmatprep.subr.bf16.mxu0 %v5750_v16  ;;  %4196 = vmatprep.subr.bf16.mxu1 %v5753_v9  ;;  %v5826_v8 = vld [vmem:[#allocation7 + $0x320] ss:$28 sps:$4 sm:$0xff]   ;;  %v5834_v9 = vld [vmem:[#allocation7 + $0x2ec] ss:$28 sps:$4 sm:$0xff]  }
 0x3b8   :  { %v5829_v16 = vld [vmem:[#allocation7 + $0x6a0] ss:$28 sps:$4 sm:$0xff]  }
 0x3ba   :  { %4156 = vmatpush2.bf16.msra.mxu0 %v5748_v10  ;;  %4197 = vmatpush2.bf16.msra.mxu1 %v5751_v11  ;;  %v5837_v10 = vld [vmem:[#allocation7 + $0x66c] ss:$28 sps:$4 sm:$0xff]  }
 0x3bb   :  { %4157 = vmatprep.subr.bf16.mxu0 %v5756_v12  ;;  %4198 = vmatprep.subr.bf16.mxu1 %v5759_v13  ;;  %v5832_v11 = vld [vmem:[#allocation7 + $0x2e8] ss:$28 sps:$4 sm:$0xff]   ;;  %v5840_v13 = vld [vmem:[#allocation7 + $0x2b4] ss:$28 sps:$4 sm:$0xff]  }
 0x3bc   :  { %v5835_v12 = vld [vmem:[#allocation7 + $0x668] ss:$28 sps:$4 sm:$0xff]  }
 0x3be   :  { %4158 = vmatpush2.bf16.msra.mxu0 %v5754_v14  ;;  %4199 = vmatpush2.bf16.msra.mxu1 %v5757_v17  ;;  %v5843_v14 = vld [vmem:[#allocation7 + $0x634] ss:$28 sps:$4 sm:$0xff]  }
 0x3bf   :  { %4159 = vmatprep.subr.bf16.mxu0 %v5762_v18  ;;  %4200 = vmatprep.subr.bf16.mxu1 %v5765_v25  ;;  %v5838_v17 = vld [vmem:[#allocation7 + $0x2b0] ss:$28 sps:$4 sm:$0xff]   ;;  %v5846_v25 = vld [vmem:[#allocation7 + $0x27c] ss:$28 sps:$4 sm:$0xff]  }
 0x3c0   :  { %v5841_v18 = vld [vmem:[#allocation7 + $0x630] ss:$28 sps:$4 sm:$0xff]  }
 0x3c2   :  { %4160 = vmatpush2.bf16.msra.mxu0 %v5760_v26  ;;  %4201 = vmatpush2.bf16.msra.mxu1 %v5763_v21  ;;  %v5849_v26 = vld [vmem:[#allocation7 + $0x5fc] ss:$28 sps:$4 sm:$0xff]  }
 0x3c3   :  { %4161 = vmatprep.subr.bf16.mxu0 %v5768_v23  ;;  %4202 = vmatprep.subr.bf16.mxu1 %v5771_v28  ;;  %v5844_v21 = vld [vmem:[#allocation7 + $0x278] ss:$28 sps:$4 sm:$0xff]   ;;  %v5852_v28 = vld [vmem:[#allocation7 + $0x244] ss:$28 sps:$4 sm:$0xff]  }
 0x3c4   :  { %v5847_v23 = vld [vmem:[#allocation7 + $0x5f8] ss:$28 sps:$4 sm:$0xff]  }
 0x3c6   :  { %4162 = vmatpush2.bf16.msra.mxu0 %v5766_v24  ;;  %4203 = vmatpush2.bf16.msra.mxu1 %v5769_v29  ;;  %v5855_v24 = vld [vmem:[#allocation7 + $0x5c4] ss:$28 sps:$4 sm:$0xff]  }
 0x3c7   :  { %4213 = vmatprep.subr.bf16.mxu0 %v5774_v30  ;;  %4254 = vmatprep.subr.bf16.mxu1 %v5777_v31  ;;  %v5850_v29 = vld [vmem:[#allocation7 + $0x240] ss:$28 sps:$4 sm:$0xff]   ;;  %v5858_v31 = vld [vmem:[#allocation7 + $0x20c] ss:$28 sps:$4 sm:$0xff]  }
 0x3c8   :  { %v5853_v30 = vld [vmem:[#allocation7 + $0x5c0] ss:$28 sps:$4 sm:$0xff]  }
 0x3c9   :  { %4164 = vmatmul.mubr.bf16.vlgmr.msra.gmra.mxu0 %v6189_v27  ;;  %4205 = vmatmul.mubr.bf16.vlgmr.msra.gmra.mxu1 %v6191_v20 }
 0x3ca   :  { %4214 = vmatpush1.bf16.msra.mxu0 %v5772_v32  ;;  %4245 = vmatprep.mubr.bf16.mxu0 %v6185_v19  ;;  %v5861_v32 = vld [vmem:[#allocation7 + $0x58c] ss:$28 sps:$4 sm:$0xff]  }
 0x3cb   :  { %4255 = vmatpush1.bf16.msra.mxu1 %v5775_v33  ;;  %4286 = vmatprep.mubr.bf16.mxu1 %v6187_v22  ;;  %v5856_v33 = vld [vmem:[#allocation7 + $0x208] ss:$28 sps:$4 sm:$0xff]  }
 0x3cc   :  { %4215 = vmatprep.subr.bf16.mxu0 %v5780_v51  ;;  %4256 = vmatprep.subr.bf16.mxu1 %v5783_v36  ;;  %v5859_v51 = vld [vmem:[#allocation7 + $0x588] ss:$28 sps:$4 sm:$0xff]   ;;  %v5864_v36 = vld [vmem:[#allocation7 + $0x1d4] ss:$28 sps:$4 sm:$0xff]  }
 0x3ce   :  { %4216 = vmatpush1.bf16.msra.mxu0 %v5778_v37  ;;  %v5867_v37 = vld [vmem:[#allocation7 + $0x554] ss:$28 sps:$4 sm:$0xff]  }
 0x3cf   :  { %4257 = vmatpush1.bf16.msra.mxu1 %v5781_v38  ;;  %4217 = vmatprep.subr.bf16.mxu0 %v5786_v39  ;;  %v5862_v38 = vld [vmem:[#allocation7 + $0x1d0] ss:$28 sps:$4 sm:$0xff]  }
 0x3d0   :  { %4258 = vmatprep.subr.bf16.mxu1 %v5789_v40  ;;  %v5865_v39 = vld [vmem:[#allocation7 + $0x550] ss:$28 sps:$4 sm:$0xff]   ;;  %v5868_v40 = vld [vmem:[#allocation7 + $0x360] ss:$28 sps:$4 sm:$0xff]  }
 0x3d2   :  { %4218 = vmatpush1.bf16.msra.mxu0 %v5784_v41  ;;  %v5869_v41 = vld [vmem:[#allocation7 + $0x6e0] ss:$28 sps:$4 sm:$0xff]  }
 0x3d3   :  { %4259 = vmatpush1.bf16.msra.mxu1 %v5787_v42  ;;  %4219 = vmatprep.subr.bf16.mxu0 %v5792_v43  ;;  %v5870_v42 = vld [vmem:[#allocation7 + $0x1a0] ss:$28 sps:$4 sm:$0xff]  }
 0x3d4   :  { %4260 = vmatprep.subr.bf16.mxu1 %v5795_v44  ;;  %v5871_v43 = vld [vmem:[#allocation7 + $0x520] ss:$28 sps:$4 sm:$0xff]   ;;  %v5872_v44 = vld [vmem:[#allocation7 + $0x328] ss:$28 sps:$4 sm:$0xff]  }
 0x3d6   :  { %4220 = vmatpush1.bf16.msra.mxu0 %v5790_v45  ;;  %v5873_v45 = vld [vmem:[#allocation7 + $0x6a8] ss:$28 sps:$4 sm:$0xff]  }
 0x3d7   :  { %4261 = vmatpush1.bf16.msra.mxu1 %v5793_v46  ;;  %4221 = vmatprep.subr.bf16.mxu0 %v5798_v48  ;;  %v5874_v46 = vld [vmem:[#allocation7 + $0x168] ss:$28 sps:$4 sm:$0xff]  }
 0x3d8   :  { %4262 = vmatprep.subr.bf16.mxu1 %v5801_v49  ;;  %v5875_v48 = vld [vmem:[#allocation7 + $0x4e8] ss:$28 sps:$4 sm:$0xff]   ;;  %v5876_v49 = vld [vmem:[#allocation7 + $0x2f0] ss:$28 sps:$4 sm:$0xff]  }
 0x3da   :  { %4222 = vmatpush1.bf16.msra.mxu0 %v5796_v50  ;;  %v5877_v50 = vld [vmem:[#allocation7 + $0x670] ss:$28 sps:$4 sm:$0xff]  }
 0x3db   :  { %4263 = vmatpush1.bf16.msra.mxu1 %v5799_v52  ;;  %4223 = vmatprep.subr.bf16.mxu0 %v5804_v53  ;;  %v5878_v52 = vld [vmem:[#allocation7 + $0x130] ss:$28 sps:$4 sm:$0xff]  }
 0x3dc   :  { %4264 = vmatprep.subr.bf16.mxu1 %v5807_v54  ;;  %v5879_v53 = vld [vmem:[#allocation7 + $0x4b0] ss:$28 sps:$4 sm:$0xff]   ;;  %v5880_v54 = vld [vmem:[#allocation7 + $0x2b8] ss:$28 sps:$4 sm:$0xff]  }
 0x3de   :  { %4224 = vmatpush1.bf16.msra.mxu0 %v5802_v55  ;;  %v5881_v55 = vld [vmem:[#allocation7 + $0x638] ss:$28 sps:$4 sm:$0xff]  }
 0x3df   :  { %4265 = vmatpush1.bf16.msra.mxu1 %v5805_v56  ;;  %4225 = vmatprep.subr.bf16.mxu0 %v5810_v57  ;;  %v5882_v56 = vld [vmem:[#allocation7 + $0xf8] ss:$28 sps:$4 sm:$0xff]   ;;  %v5884_v57 = vld [vmem:[#allocation7 + $0x280] ss:$28 sps:$4 sm:$0xff]  }
 0x3e0   :  { %4266 = vmatprep.subr.bf16.mxu1 %v5813_v58  ;;  %v5885_v58 = vld [vmem:[#allocation7 + $0x600] ss:$28 sps:$4 sm:$0xff]  }
 0x3e2   :  { %4226 = vmatpush1.bf16.msra.mxu0 %v5808_v59  ;;  %v5887_v59 = vld [vmem:[#allocation7 + $0x440] ss:$28 sps:$4 sm:$0xff]  }
 0x3e3   :  { %4267 = vmatpush1.bf16.msra.mxu1 %v5811_v60  ;;  %4227 = vmatprep.subr.bf16.mxu0 %v5816_v61  ;;  %v5888_v60 = vld [vmem:[#allocation7 + $0x248] ss:$28 sps:$4 sm:$0xff]  }
 0x3e4   :  { %4268 = vmatprep.subr.bf16.mxu1 %v5819_v62  ;;  %v5889_v61 = vld [vmem:[#allocation7 + $0x5c8] ss:$28 sps:$4 sm:$0xff]  }
 0x3e5   :  { %v5890_v62 = vld [vmem:[#allocation7 + $0x88] ss:$28 sps:$4 sm:$0xff]  }
 0x3e6   :  { %4228 = vmatpush1.bf16.msra.mxu0 %v5814_v47  ;;  %v5891_v47 = vld [vmem:[#allocation7 + $0x408] ss:$28 sps:$4 sm:$0xff]  }
 0x3e7   :  { %4269 = vmatpush1.bf16.msra.mxu1 %v5817_v6  ;;  %4229 = vmatprep.subr.bf16.mxu0 %v5822_v15  ;;  %v5892_v6 = vld [vmem:[#allocation7 + $0x210] ss:$28 sps:$4 sm:$0xff]  }
 0x3e8   :  { %4270 = vmatprep.subr.bf16.mxu1 %v5825_v1  ;;  %v5893_v15 = vld [vmem:[#allocation7 + $0x590] ss:$28 sps:$4 sm:$0xff]  }
 0x3e9   :  { %v5894_v1 = vld [vmem:[#allocation7 + $0x50] ss:$28 sps:$4 sm:$0xff]  }
 0x3ea   :  { %4230 = vmatpush2.bf16.msra.mxu0 %v5820_v3  ;;  %v5895_v3 = vld [vmem:[#allocation7 + $0x3d0] ss:$28 sps:$4 sm:$0xff]  }
 0x3eb   :  { %4271 = vmatpush2.bf16.msra.mxu1 %v5823_v4  ;;  %4231 = vmatprep.subr.bf16.mxu0 %v5828_v35  ;;  %v5896_v4 = vld [vmem:[#allocation7 + $0x1d8] ss:$28 sps:$4 sm:$0xff]  }
 0x3ec   :  { %4272 = vmatprep.subr.bf16.mxu1 %v5831_v5  ;;  %v5897_v35 = vld [vmem:[#allocation7 + $0x558] ss:$28 sps:$4 sm:$0xff]  }
 0x3ed   :  { %v5898_v5 = vld [vmem:[#allocation7 + $0x18] ss:$28 sps:$4 sm:$0xff]  }
 0x3ee   :  { %4232 = vmatpush2.bf16.msra.mxu0 %v5826_v8  ;;  %v5899_v8 = vld [vmem:[#allocation7 + $0x398] ss:$28 sps:$4 sm:$0xff]  }
 0x3ef   :  { %4273 = vmatpush2.bf16.msra.mxu1 %v5829_v16  ;;  %4233 = vmatprep.subr.bf16.mxu0 %v5834_v9  ;;  %v6212_v16 = vld [vmem:[%s6246_s6 + $0xa] sm:$0xff] }
 0x3f0   :  { %4274 = vmatprep.subr.bf16.mxu1 %v5837_v10  ;;  %v2865_v9 = vrot.slane %v6212_v16, %v6143_v0  ;;  %v2869_v10 = vrot.slane %v6212_v16, %v6149_v2 }
 0x3f2   :  { %4234 = vmatpush2.bf16.msra.mxu0 %v5832_v11 }
 0x3f3   :  { %4275 = vmatpush2.bf16.msra.mxu1 %v5835_v12  ;;  %4235 = vmatprep.subr.bf16.mxu0 %v5840_v13 }
 0x3f4   :  { %4276 = vmatprep.subr.bf16.mxu1 %v5843_v14 }
 0x3f6   :  { %4236 = vmatpush2.bf16.msra.mxu0 %v5838_v17 }
 0x3f7   :  { %4277 = vmatpush2.bf16.msra.mxu1 %v5841_v18  ;;  %4237 = vmatprep.subr.bf16.mxu0 %v5846_v25 }
 0x3f8   :  { %4278 = vmatprep.subr.bf16.mxu1 %v5849_v26 }
 0x3fa   :  { %4238 = vmatpush2.bf16.msra.mxu0 %v5844_v21 }
 0x3fb   :  { %4279 = vmatpush2.bf16.msra.mxu1 %v5847_v23  ;;  %4239 = vmatprep.subr.bf16.mxu0 %v5852_v28 }
 0x3fc   :  { %4280 = vmatprep.subr.bf16.mxu1 %v5855_v24 }
 0x3fe   :  { %4240 = vmatpush2.bf16.msra.mxu0 %v5850_v29 }
 0x3ff   :  { %4281 = vmatpush2.bf16.msra.mxu1 %v5853_v30  ;;  %4241 = vmatprep.subr.bf16.mxu0 %v5858_v31 }
 0x400   :  { %4282 = vmatprep.subr.bf16.mxu1 %v5861_v32 }
 0x402   :  { %4242 = vmatpush2.bf16.msra.mxu0 %v5856_v33 }
 0x403   :  { %4283 = vmatpush2.bf16.msra.mxu1 %v5859_v51  ;;  %4243 = vmatprep.subr.bf16.mxu0 %v5864_v36  ;;  %v2873_v51 = vrot.slane %v6212_v16, %v6159_v7  ;;  %v2877_v36 = vrot.slane %v6212_v16, %v6162_v34 }
 0x404   :  { %4284 = vmatprep.subr.bf16.mxu1 %v5867_v37 }
 0x406   :  { %4244 = vmatpush2.bf16.msra.mxu0 %v5862_v38 }
 0x407   :  { %4285 = vmatpush2.bf16.msra.mxu1 %v5865_v39  ;;  %5038 = vmatprep.subr.bf16.mxu0 %v5868_v40 }
 0x408   :  { %5060 = vmatprep.subr.bf16.mxu1 %v5869_v41 }
 0x409   :  { %4246 = vmatmul.mubr.bf16.vlgmr.msra.gmra.mxu0 %v6189_v27 }
 0x40a   :  { %4287 = vmatmul.mubr.bf16.vlgmr.msra.gmra.mxu1 %v6191_v20  ;;  %5039 = vmatpush3.bf16.msra.mxu0 %v5870_v42 }
 0x40b   :  { %4327 = vmatprep.mubr.bf16.mxu0 %v6185_v19  ;;  %5061 = vmatpush3.bf16.msra.mxu1 %v5871_v43  ;;  %v5883_v19 = vld [vmem:[#allocation7 + $0x478] ss:$28 sps:$4 sm:$0xff]  }
 0x40c   :  { %4367 = vmatprep.mubr.bf16.mxu1 %v6187_v22  ;;  %5040 = vmatprep.subr.bf16.mxu0 %v5872_v44  ;;  %v5886_v22 = vld [vmem:[#allocation7 + $0xc0] ss:$28 sps:$4 sm:$0xff]  }
 0x40d   :  { %5062 = vmatprep.subr.bf16.mxu1 %v5873_v45 }
 0x40e   :  { %5041 = vmatpush3.bf16.msra.mxu0 %v5874_v46 }
 0x40f   :  { %5063 = vmatpush3.bf16.msra.mxu1 %v5875_v48  ;;  %5042 = vmatprep.subr.bf16.mxu0 %v5876_v49 }
 0x410   :  { %5064 = vmatprep.subr.bf16.mxu1 %v5877_v50 }
 0x412   :  { %5043 = vmatpush3.bf16.msra.mxu0 %v5878_v52 }
 0x413   :  { %5065 = vmatpush3.bf16.msra.mxu1 %v5879_v53  ;;  %5044 = vmatprep.subr.bf16.mxu0 %v5880_v54 }
 0x414   :  { %5066 = vmatprep.subr.bf16.mxu1 %v5881_v55 }
 0x416   :  { %5045 = vmatpush3.bf16.msra.mxu0 %v5882_v56 }
 0x417   :  { %5067 = vmatpush3.bf16.msra.mxu1 %v5883_v19  ;;  %5046 = vmatprep.subr.bf16.mxu0 %v5884_v57  ;;  %v2880_v57 = vsub.s32 4, %v6140_v63 }
 0x418   :  { %5068 = vmatprep.subr.bf16.mxu1 %v5885_v58  ;;  %v2884_v58 = vsub.s32 5, %v6140_v63 }
 0x41a   :  { %5047 = vmatpush3.bf16.msra.mxu0 %v5886_v22  ;;  %v2881_v22 = vrot.slane %v6212_v16, %v2880_v57 }
 0x41b   :  { %5069 = vmatpush3.bf16.msra.mxu1 %v5887_v59  ;;  %5048 = vmatprep.subr.bf16.mxu0 %v5888_v60  ;;  %v2885_v59 = vrot.slane %v6212_v16, %v2884_v58 }
 0x41c   :  { %5070 = vmatprep.subr.bf16.mxu1 %v5889_v61 }
 0x41e   :  { %5049 = vmatpush3.bf16.msra.mxu0 %v5890_v62 }
 0x41f   :  { %5071 = vmatpush3.bf16.msra.mxu1 %v5891_v47  ;;  %5050 = vmatprep.subr.bf16.mxu0 %v5892_v6 }
 0x420   :  { %5072 = vmatprep.subr.bf16.mxu1 %v5893_v15 }
 0x422   :  { %5051 = vmatpush3.bf16.msra.mxu0 %v5894_v1 }
 0x423   :  { %5073 = vmatpush3.bf16.msra.mxu1 %v5895_v3  ;;  %5052 = vmatprep.subr.bf16.mxu0 %v5896_v4 }
 0x424   :  { %5074 = vmatprep.subr.bf16.mxu1 %v5897_v35 }
 0x426   :  { %5053 = vmatpush3.bf16.msra.mxu0 %v5898_v5 }
 0x427   :  { %5075 = vmatpush3.bf16.msra.mxu1 %v5899_v8 }
 0x429   :  { %4328 = vmatmul.mubr.bf16.vlgmr.msra.gmra.mxu0 %v6189_v27 }
 0x42a   :  { %4368 = vmatmul.mubr.bf16.vlgmr.msra.gmra.mxu1 %v6191_v20 }
 0x449   :  { %v4083_v11 = vpop.f32.mrf.mxu0  ;;  %v4124_v12 = vpop.f32.mrf.mxu1 }
 0x44a   :  { %v4084_v13 = vadd.f32 %v4083_v11, %v2865_v9 }
 0x44b   :  { %v4085_v14 = vpop.f32.mrf.mxu0  ;;  %v4126_v17 = vpop.f32.mrf.mxu1 }
 0x44c   :  { %v4125_v18 = vadd.f32 %v4124_v12, %v4084_v13  ;;  %v4086_v27 = vadd.f32 %v4085_v14, %v2869_v10 }
 0x44d   :  { %v4087_v25 = vpop.f32.mrf.mxu0  ;;  %v4128_v20 = vpop.f32.mrf.mxu1 }
 0x44e   :  { %v5021_v26 = vmul.f32 -1.442695, %v4125_v18  ;;  %v4127_v21 = vadd.f32 %v4126_v17, %v4086_v27  ;;  %v2888_v17 = vsub.s32 6, %v6140_v63 }
 0x44f   :  { %v4088_v23 = vpop.f32.mrf.mxu0  ;;  %v4129_v28 = vpop.f32.mrf.mxu1 }
 0x450   :  { %5902 = vpow2.f32 %v5021_v26  ;;  %v5022_v24 = vmul.f32 -1.442695, %v4127_v21  ;;  %v2889_v25 = vrot.slane %v6212_v16, %v2888_v17 }
 0x452   :  { %5904 = vpow2.f32 %v5022_v24 }
 0x45d   :  { %v5903_v0 = vpop.eup %5902 }
 0x45e   :  { %v4396_v29 = vadd.f32 1.0, %v5903_v0 }
 0x45f   :  { %v5905_v30 = vpop.eup %5904 }
 0x460   :  { %v4397_v2 = vadd.f32 1.0, %v5905_v30  ;;  %5906 = vrcp.f32 %v4396_v29 }
 0x462   :  { %5908 = vrcp.f32 %v4397_v2 }
 0x46d   :  { %v5907_v31 = vpop.eup %5906 }
 0x46f   :  { %v5909_v32 = vpop.eup %5908 }
 0x470   :  { %v5033_v33 = vpack.c.bf16 %v5909_v32, %v5907_v31 }
 0x472   :  { %4446 = vst [vmem:[%s6247_s7] sm:$0xff] %v5033_v33 }
 0x489   :  { %v4165_v37 = vpop.f32.mrf.mxu0  ;;  %v4206_v38 = vpop.f32.mrf.mxu1 }
 0x48a   :  { %v4166_v39 = vadd.f32 %v4165_v37, %v2873_v51 }
 0x48b   :  { %v4167_v40 = vpop.f32.mrf.mxu0  ;;  %v4208_v41 = vpop.f32.mrf.mxu1 }
 0x48c   :  { %v4207_v42 = vadd.f32 %v4206_v38, %v4166_v39  ;;  %v4168_v43 = vadd.f32 %v4167_v40, %v2877_v36 }
 0x48d   :  { %v4169_v44 = vpop.f32.mrf.mxu0  ;;  %v4210_v45 = vpop.f32.mrf.mxu1 }
 0x48e   :  { %v5023_v46 = vmul.f32 -1.442695, %v4207_v42  ;;  %v4209_v48 = vadd.f32 %v4208_v41, %v4168_v43 }
 0x48f   :  { %v4170_v49 = vpop.f32.mrf.mxu0  ;;  %v4211_v50 = vpop.f32.mrf.mxu1 }
 0x490   :  { %5910 = vpow2.f32 %v5023_v46  ;;  %v5024_v52 = vmul.f32 -1.442695, %v4209_v48 }
 0x492   :  { %5912 = vpow2.f32 %v5024_v52 }
 0x49d   :  { %v5911_v7 = vpop.eup %5910 }
 0x49e   :  { %v4398_v53 = vadd.f32 1.0, %v5911_v7 }
 0x49f   :  { %v5913_v54 = vpop.eup %5912 }
 0x4a0   :  { %v4399_v34 = vadd.f32 1.0, %v5913_v54  ;;  %5914 = vrcp.f32 %v4398_v53 }
 0x4a2   :  { %5916 = vrcp.f32 %v4399_v34 }
 0x4ad   :  { %v5915_v55 = vpop.eup %5914 }
 0x4af   :  { %v5917_v56 = vpop.eup %5916 }
 0x4b0   :  { %v5034_v19 = vpack.c.bf16 %v5917_v56, %v5915_v55 }
 0x4b2   :  { %4447 = vst [vmem:[%s6247_s7 + $0x8] sm:$0xff] %v5034_v19 }
 0x4c9   :  { %v4247_v60 = vpop.f32.mrf.mxu0 }
 0x4ca   :  { %v4248_v61 = vadd.f32 %v4247_v60, %v2881_v22  ;;  %v4288_v62 = vpop.f32.mrf.mxu1 }
 0x4cb   :  { %v4249_v47 = vpop.f32.mrf.mxu0 }
 0x4cc   :  { %v4289_v6 = vadd.f32 %v4288_v62, %v4248_v61  ;;  %v4250_v15 = vadd.f32 %v4249_v47, %v2885_v59  ;;  %v4290_v1 = vpop.f32.mrf.mxu1 }
 0x4cd   :  { %v4251_v3 = vpop.f32.mrf.mxu0 }
 0x4ce   :  { %v5025_v4 = vmul.f32 -1.442695, %v4289_v6  ;;  %v4291_v35 = vadd.f32 %v4290_v1, %v4250_v15  ;;  %v4292_v5 = vpop.f32.mrf.mxu1 }
 0x4cf   :  { %v4252_v8 = vpop.f32.mrf.mxu0 }
 0x4d0   :  { %5918 = vpow2.f32 %v5025_v4  ;;  %v5026_v9 = vmul.f32 -1.442695, %v4291_v35  ;;  %v4293_v10 = vpop.f32.mrf.mxu1 }
 0x4d2   :  { %5920 = vpow2.f32 %v5026_v9 }
 0x4dd   :  { %v5919_v11 = vpop.eup %5918 }
 0x4de   :  { %v4400_v12 = vadd.f32 1.0, %v5919_v11 }
 0x4df   :  { %v5921_v13 = vpop.eup %5920 }
 0x4e0   :  { %v4401_v14 = vadd.f32 1.0, %v5921_v13  ;;  %5922 = vrcp.f32 %v4400_v12 }
 0x4e2   :  { %5924 = vrcp.f32 %v4401_v14 }
 0x4e9   :  { %v5054_v18 = vpop.f32.mrf.mxu0 }
 0x4ea   :  { %v5076_v27 = vpop.f32.mrf.mxu1 }
 0x4eb   :  { %v5055_v20 = vpop.f32.mrf.mxu0 }
 0x4ec   :  { %v5056_v26 = vadd.f32 %v5055_v20, %v5054_v18  ;;  %v5077_v21 = vpop.f32.mrf.mxu1 }
 0x4ed   :  { %v5057_v23 = vpop.f32.mrf.mxu0  ;;  %v5923_v28 = vpop.eup %5922  ;;  %v5078_v0 = vadd.f32 %v5077_v21, %v5076_v27 }
 0x4ee   :  { %v4330_v24 = vadd.f32 %v5056_v26, %v2889_v25  ;;  %v5079_v29 = vpop.f32.mrf.mxu1 }
 0x4ef   :  { %v5925_v30 = vpop.eup %5924  ;;  %v5058_v2 = vpop.f32.mrf.mxu0 }
 0x4f0   :  { %v5035_v31 = vpack.c.bf16 %v5925_v30, %v5923_v28  ;;  %v4370_v32 = vadd.f32 %v5078_v0, %v4330_v24  ;;  %v5080_v33 = vpop.f32.mrf.mxu1 }
 0x4f2   :  { %4448 = vst [vmem:[%s6247_s7 + $0x10] sm:$0xff] %v5035_v31  ;;  %v5027_v63 = vmul.f32 -1.442695, %v4370_v32 }
 0x4f4   :  { %5926 = vpow2.f32 %v5027_v63 }
 0x501   :  { %v5927_v16 = vpop.eup %5926 }
 0x502   :  { %v4402_v51 = vadd.f32 1.0, %v5927_v16 }
 0x504   :  { %5928 = vrcp.f32 %v4402_v51 }
 0x511   :  { %v5929_v36 = vpop.eup %5928 }
 0x512   :  { %v5036_v37 = vpack.c.bf16 %v5929_v36, %v5929_v36 }
 0x514   :  { %4449 = vst [vmem:[%s6247_s7 + $0x18] sm:$0xf] %v5036_v37 }
 0x515   :  { %4467 = vsyncpa [#allocation3], 1 }
 0x516   :  { %4468 = vsyncpa [#allocation5], 1 }
 0x517   :  { %4469 = vsyncpa [#allocation8], 1 }

</bundles_post_ra>
